<compile_context>
chip_gen: v5e
topology: v5e:2x2
jax: 0.10.0
libtpu: 0.0.40
codegen_flags: <defaults>
</compile_context>

<pallas_src>
import jax
import jax.numpy as jnp
import numpy as np
from jax import lax
from jax.experimental import pallas as pl
from jax.experimental.pallas import tpu as pltpu


def _make_kernel(bb, Ct, N, W, mxu_dtype):
    """Fused per-grid-step kernel.

    bb: batch elements per grid step (concatenated along the matmul N axis)
    Ct: C*T (sublane axis), N: H*W (lane axis, output is lane-dense), W: width
    mxu_dtype: dtype of the MXU matmul inputs (bf16 fast path, f32 reference path)
    """
    # Tap shifts for the (1,3,3) spatial depthwise conv on the flat (h w) layout,
    # ordered exactly like the PyTorch kernel flattening (kh-major, kw-minor).
    shifts = [dh * W + dw for dh in (-1, 0, 1) for dw in (-1, 0, 1)]

    def _shift(buf, s):
        # slab[p] = buf[p + s]; zero fill at the ends (row/col masks kill any lane
        # that wrapped into the wrong row or fell outside the image anyway).
        z = jnp.zeros((Ct, abs(s)), buf.dtype)
        if s > 0:
            return jnp.concatenate([buf[:, s:], z], axis=1)
        return jnp.concatenate([z, buf[:, :s]], axis=1)

    def kernel(x_ref, wsp_ref, mask_ref, m1_ref, b1_ref, m2_ref, b2_ref, o_ref):
        wsp = wsp_ref[...]              # (Ct, 9)  f32 spatial depthwise weights
        masks = mask_ref[...]           # (9, N)   f32 0/1 boundary masks

        bufs, accs = [], []
        for i in range(bb):
            buf = x_ref[i]              # (Ct, N) f32 -- lane-aligned, offset 0
            # ---- dwconv_r2: (1,3,3) depthwise spatial conv = 9 shifted FMAs (VPU)
            acc = wsp[:, 4:5] * buf     # center tap (always in-bounds, no mask)
            for ti, s in enumerate(shifts):
                if s == 0:
                    continue
                slab = _shift(buf, s) * masks[ti:ti + 1, :]
                acc = acc + wsp[:, ti:ti + 1] * slab
            bufs.append(buf)
            accs.append(acc)
        acc_all = accs[0] if bb == 1 else jnp.concatenate(accs, axis=1)  # (Ct, bb*N)

        # ---- pwconv_r2 + BN1 scale folded into one matmul (bf16 MXU in, f32 acc);
        #      BN1 shift + ReLU fused into the epilogue.
        y = jnp.dot(m1_ref[...], acc_all.astype(mxu_dtype),
                    preferred_element_type=jnp.float32)
        y = jnp.maximum(y + b1_ref[...], 0.0)

        # ---- dwconv_r1 (3,1,1 temporal) + pwconv_r1 + BN2 scale in one matmul ----
        out_all = jnp.dot(m2_ref[...], y.astype(mxu_dtype),
                          preferred_element_type=jnp.float32)

        # fused BN2 shift + residual + ReLU: one pass over each lane-dense out tile
        for i in range(bb):
            o = out_all[:, i * N:(i + 1) * N] + b2_ref[...] + bufs[i]
            o_ref[i] = jnp.maximum(o, 0.0).astype(o_ref.dtype)

    return kernel


def _pick_batch_block(B, N, max_lanes=2048):
    """Largest divisor of B that still leaves >= 2 grid steps (v7x has 2 TCs) and
    keeps the live (CmT, bb*N) intermediate bounded."""
    bb = 1
    for cand in range(1, B + 1):
        if B % cand:
            continue
        if B // cand < 2:
            continue
        if cand * N > max_lanes:
            continue
        bb = cand
    return bb


def separable_r2plus1d_forward(x, params, eps=1e-5,
                               mxu_dtype=jnp.bfloat16, batch_block=None):
    """x: (B, C, T, H, W) float32.  params: raw module parameters (see __main__)."""
    (w_dw2, w_pw2, g1, be1, rm1, rv1, w_dw1, w_pw1, g2, be2, rm2, rv2) = params
    B, C, T, H, W = x.shape
    Cmid = w_pw2.shape[0]
    Ct, CmT, N = C * T, Cmid * T, H * W

    bb = batch_block if batch_block is not None else _pick_batch_block(B, N)
    assert B % bb == 0

    # ---------------- parameter folding (host-side, tiny) ----------------
    eyeT = jnp.eye(T, dtype=jnp.float32)

    # spatial depthwise weights, shared across T: (C*T, 9)
    wsp = jnp.repeat(w_dw2.reshape(C, 9), T, axis=0)

    # eval-mode BatchNorm -> per-channel scale/shift
    s1 = g1 / jnp.sqrt(rv1 + eps)
    sh1 = be1 - rm1 * s1
    s2 = g2 / jnp.sqrt(rv2 + eps)
    sh2 = be2 - rm2 * s2

    # pwconv_r2 (+BN1 scale) acting on the flattened (c t) axis: kron(W1, I_T)
    m1 = jnp.kron(w_pw2.reshape(Cmid, C) * s1[:, None], eyeT)          # (CmT, Ct)
    b1 = jnp.repeat(sh1, T)[:, None]                                    # (CmT, 1)

    # temporal depthwise conv (3,1,1), pad 1 -> block-diagonal (CmT, CmT) operator
    t_out = jnp.arange(T)[:, None]
    t_in = jnp.arange(T)[None, :]
    d = t_in - t_out
    band = ((d >= -1) & (d <= 1)).astype(jnp.float32)
    tap = jnp.clip(d + 1, 0, 2)
    wtmp = w_dw1.reshape(Cmid, 3)
    a_per = wtmp[:, tap] * band[None]                                   # (Cmid, T, T)
    A = jnp.einsum('mab,mn->manb', a_per,
                   jnp.eye(Cmid, dtype=jnp.float32)).reshape(CmT, CmT)

    # pwconv_r1 (+BN2 scale) composed with the temporal operator: (Ct, CmT)
    m2 = jnp.dot(jnp.kron(w_pw1.reshape(C, Cmid) * s2[:, None], eyeT), A,
                 precision=lax.Precision.HIGHEST)
    b2 = jnp.repeat(sh2, T)[:, None]                                    # (Ct, 1)

    # MXU inputs in bf16 (fast path) or f32 (validation path); accumulation is f32.
    m1 = m1.astype(mxu_dtype)
    m2 = m2.astype(mxu_dtype)

    # 0/1 boundary masks for the 9 spatial taps on the flat (h w) lane axis.
    rows = np.arange(N) // W
    cols = np.arange(N) % W
    masks_np = np.zeros((9, N), np.float32)
    ti = 0
    for dh in (-1, 0, 1):
        for dw in (-1, 0, 1):
            ok = ((rows + dh >= 0) & (rows + dh < H) &
                  (cols + dw >= 0) & (cols + dw < W))
            masks_np[ti] = ok
            ti += 1
    masks = jnp.asarray(masks_np)

    # 'b c t h w -> b (c t) (h w)': pure reshape, no extra HBM pass, no padding.
    x_flat = x.reshape(B, Ct, N)

    kernel = _make_kernel(bb, Ct, N, W, mxu_dtype)

    itemsize = jnp.dtype(mxu_dtype).itemsize
    cost = pl.CostEstimate(
        flops=int(B * N * (18 * Ct + 4 * Ct * CmT + 6 * Ct + 2 * CmT)),
        transcendentals=0,
        bytes_accessed=int(8 * B * Ct * N                       # in + out slabs (f32)
                           + 4 * (Ct * 9 + 9 * N + CmT + Ct)    # wsp, masks, biases
                           + itemsize * 2 * CmT * Ct),          # m1, m2
    )

    out_flat = pl.pallas_call(
        kernel,
        out_shape=jax.ShapeDtypeStruct((B, Ct, N), x.dtype),
        grid=(B // bb,),
        in_specs=[
            pl.BlockSpec((bb, Ct, N), lambda b: (b, 0, 0)),   # input slab (lane-dense)
            pl.BlockSpec((Ct, 9), lambda b: (0, 0)),          # spatial dw weights
            pl.BlockSpec((9, N), lambda b: (0, 0)),           # boundary masks
            pl.BlockSpec((CmT, Ct), lambda b: (0, 0)),        # M1 (pwconv_r2 + BN1 scale)
            pl.BlockSpec((CmT, 1), lambda b: (0, 0)),         # b1 (BN1 shift)
            pl.BlockSpec((Ct, CmT), lambda b: (0, 0)),        # M2 (temporal+pwconv_r1+BN2)
            pl.BlockSpec((Ct, 1), lambda b: (0, 0)),          # b2 (BN2 shift)
        ],
        out_specs=pl.BlockSpec((bb, Ct, N), lambda b: (b, 0, 0)),
        compiler_params=pltpu.CompilerParams(
            dimension_semantics=("parallel",),
            vmem_limit_bytes=32 * 1024 * 1024),
        cost_estimate=cost,
    )(x_flat, wsp, masks, m1, b1, m2, b2)

    # 'b (c t) (h w) -> b c t h w' : free reshape, nothing to slice off.
    return out_flat.reshape(B, C, T, H, W)


def reference(x, params, eps=1e-5):
    """Pure-JAX reference matching the PyTorch module (eval-mode BN)."""
    (w_dw2, w_pw2, g1, be1, rm1, rv1, w_dw1, w_pw1, g2, be2, rm2, rv2) = params
    C = x.shape[1]
    Cmid = w_pw2.shape[0]
    dn = ('NCDHW', 'OIDHW', 'NCDHW')
    hi = lax.Precision.HIGHEST

    def bn(y, g, b, rm, rv):
        sh = (None, slice(None), None, None, None)
        return (y - rm[sh]) / jnp.sqrt(rv + eps)[sh] * g[sh] + b[sh]

    y = lax.conv_general_dilated(x, w_dw2, (1, 1, 1), ((0, 0), (1, 1), (1, 1)),
                                 dimension_numbers=dn, feature_group_count=C,
                                 precision=hi)
    y = lax.conv_general_dilated(y, w_pw2, (1, 1, 1), ((0, 0), (0, 0), (0, 0)),
                                 dimension_numbers=dn, precision=hi)
    y = jnp.maximum(bn(y, g1, be1, rm1, rv1), 0.0)
    y = lax.conv_general_dilated(y, w_dw1, (1, 1, 1), ((1, 1), (0, 0), (0, 0)),
                                 dimension_numbers=dn, feature_group_count=Cmid,
                                 precision=hi)
    y = lax.conv_general_dilated(y, w_pw1, (1, 1, 1), ((0, 0), (0, 0), (0, 0)),
                                 dimension_numbers=dn, precision=hi)
    y = bn(y, g2, be2, rm2, rv2) + x          # residual (not downsampled)
    return jnp.maximum(y, 0.0)


if __name__ == "__main__":
    # Small shapes consistent with the module: in=out=8 channels (residual requires
    # equality), mid=16, T=8, spatial 16x16, batch 2, kernel_size=3.
    B, C, Cmid, T, H, W = 2, 8, 16, 8, 16, 16

    key = jax.random.PRNGKey(0)
    ks = jax.random.split(key, 14)
    x = jax.random.normal(ks[0], (B, C, T, H, W), jnp.float32)

    # Raw module parameters (PyTorch layouts), deterministic init.
    w_dw2 = 0.3 * jax.random.normal(ks[1], (C, 1, 1, 3, 3), jnp.float32)      # dwconv_r2
    w_pw2 = 0.3 * jax.random.normal(ks[2], (Cmid, C, 1, 1, 1), jnp.float32)   # pwconv_r2
    g1 = 1.0 + 0.1 * jax.random.normal(ks[3], (Cmid,), jnp.float32)           # bn1
    be1 = 0.1 * jax.random.normal(ks[4], (Cmid,), jnp.float32)
    rm1 = 0.1 * jax.random.normal(ks[5], (Cmid,), jnp.float32)
    rv1 = jnp.abs(1.0 + 0.1 * jax.random.normal(ks[6], (Cmid,), jnp.float32))
    w_dw1 = 0.3 * jax.random.normal(ks[7], (Cmid, 1, 3, 1, 1), jnp.float32)   # dwconv_r1
    w_pw1 = 0.3 * jax.random.normal(ks[8], (C, Cmid, 1, 1, 1), jnp.float32)   # pwconv_r1
    g2 = 1.0 + 0.1 * jax.random.normal(ks[9], (C,), jnp.float32)              # bn2
    be2 = 0.1 * jax.random.normal(ks[10], (C,), jnp.float32)
    rm2 = 0.1 * jax.random.normal(ks[11], (C,), jnp.float32)
    rv2 = jnp.abs(1.0 + 0.1 * jax.random.normal(ks[12], (C,), jnp.float32))

    params = (w_dw2, w_pw2, g1, be1, rm1, rv1, w_dw1, w_pw1, g2, be2, rm2, rv2)

    # Fast path: bf16 MXU inputs, f32 accumulation.
    out_bf16 = separable_r2plus1d_forward(x, params, mxu_dtype=jnp.bfloat16)
    jax.block_until_ready(out_bf16)

    # Validation path: f32 MXU inputs (exact semantics check).
    out_f32 = separable_r2plus1d_forward(x, params, mxu_dtype=jnp.float32)
    jax.block_until_ready(out_f32)

    ref = reference(x, params)
    np.testing.assert_allclose(np.asarray(out_f32), np.asarray(ref),
                               rtol=1e-3, atol=1e-3)
    # bf16 matmul inputs bound the error to ~a few 1e-3 absolute at these magnitudes.
    np.testing.assert_allclose(np.asarray(out_bf16), np.asarray(ref),
                               rtol=1e-2, atol=1e-2)
    print("KERNEL_OK")
</pallas_src>

<mosaic_0001>
module attributes {stable_mosaic.version = 11 : i64} {
  func.func @kernel(%arg0: i32, %arg1: memref<1x64x256xf32, #tpu.memory_space<vmem>>, %arg2: memref<64x9xf32, #tpu.memory_space<vmem>>, %arg3: memref<9x256xf32, #tpu.memory_space<vmem>>, %arg4: memref<128x64xbf16, #tpu.memory_space<vmem>>, %arg5: memref<128x1xf32, #tpu.memory_space<vmem>>, %arg6: memref<64x128xbf16, #tpu.memory_space<vmem>>, %arg7: memref<64x1xf32, #tpu.memory_space<vmem>>, %arg8: memref<1x64x256xf32, #tpu.memory_space<vmem>>) attributes {dimension_semantics = [#tpu.dimension_semantics<parallel>], iteration_bounds = array<i64: 2>, scalar_prefetch = 0 : i64, scratch_operands = 0 : i64, tpu.core_type = #tpu.core_type<tc>, window_params = [{transform_indices = @transform_0, window_bounds = array<i64: 1, 64, 256>}, {pipeline_mode = #tpu.pipeline_mode<synchronous>, transform_indices = @transform_1, window_bounds = array<i64: 64, 9>}, {pipeline_mode = #tpu.pipeline_mode<synchronous>, transform_indices = @transform_2, window_bounds = array<i64: 9, 256>}, {pipeline_mode = #tpu.pipeline_mode<synchronous>, transform_indices = @transform_3, window_bounds = array<i64: 128, 64>}, {pipeline_mode = #tpu.pipeline_mode<synchronous>, transform_indices = @transform_4, window_bounds = array<i64: 128, 1>}, {pipeline_mode = #tpu.pipeline_mode<synchronous>, transform_indices = @transform_5, window_bounds = array<i64: 64, 128>}, {pipeline_mode = #tpu.pipeline_mode<synchronous>, transform_indices = @transform_6, window_bounds = array<i64: 64, 1>}, {transform_indices = @transform_7, window_bounds = array<i64: 1, 64, 256>}]} {
    %c0 = arith.constant 0 : index
    %c0_0 = arith.constant 0 : index
    %0 = vector.load %arg2[%c0, %c0_0] : memref<64x9xf32, #tpu.memory_space<vmem>>, vector<64x9xf32>
    %c0_1 = arith.constant 0 : index
    %c0_2 = arith.constant 0 : index
    %1 = vector.load %arg3[%c0_1, %c0_2] : memref<9x256xf32, #tpu.memory_space<vmem>>, vector<9x256xf32>
    %c0_3 = arith.constant 0 : index
    %c0_4 = arith.constant 0 : index
    %c0_5 = arith.constant 0 : index
    %2 = vector.load %arg1[%c0_3, %c0_4, %c0_5] : memref<1x64x256xf32, #tpu.memory_space<vmem>>, vector<1x64x256xf32>
    %3 = vector.shape_cast %2 : vector<1x64x256xf32> to vector<64x256xf32>
    %4 = vector.extract_strided_slice %0 {offsets = [0, 4], sizes = [64, 1], strides = [1, 1]} : vector<64x9xf32> to vector<64x1xf32>
    %5 = vector.broadcast %4 : vector<64x1xf32> to vector<64x256xf32>
    %6 = arith.mulf %5, %3 : vector<64x256xf32>
    %cst = arith.constant 0.000000e+00 : f32
    %7 = vector.broadcast %cst : f32 to vector<64x17xf32>
    %8 = vector.extract_strided_slice %3 {offsets = [0, 0], sizes = [64, 239], strides = [1, 1]} : vector<64x256xf32> to vector<64x239xf32>
    %9 = tpu.concatenate %7, %8 in 1 : vector<64x17xf32>, vector<64x239xf32> -> vector<64x256xf32>
    %10 = vector.extract_strided_slice %1 {offsets = [0, 0], sizes = [1, 256], strides = [1, 1]} : vector<9x256xf32> to vector<1x256xf32>
    %11 = vector.broadcast %10 : vector<1x256xf32> to vector<64x256xf32>
    %12 = arith.mulf %9, %11 : vector<64x256xf32>
    %13 = vector.extract_strided_slice %0 {offsets = [0, 0], sizes = [64, 1], strides = [1, 1]} : vector<64x9xf32> to vector<64x1xf32>
    %14 = vector.broadcast %13 : vector<64x1xf32> to vector<64x256xf32>
    %15 = arith.mulf %14, %12 : vector<64x256xf32>
    %16 = arith.addf %6, %15 : vector<64x256xf32>
    %cst_6 = arith.constant 0.000000e+00 : f32
    %17 = vector.broadcast %cst_6 : f32 to vector<64x16xf32>
    %18 = vector.extract_strided_slice %3 {offsets = [0, 0], sizes = [64, 240], strides = [1, 1]} : vector<64x256xf32> to vector<64x240xf32>
    %19 = tpu.concatenate %17, %18 in 1 : vector<64x16xf32>, vector<64x240xf32> -> vector<64x256xf32>
    %20 = vector.extract_strided_slice %1 {offsets = [1, 0], sizes = [1, 256], strides = [1, 1]} : vector<9x256xf32> to vector<1x256xf32>
    %21 = vector.broadcast %20 : vector<1x256xf32> to vector<64x256xf32>
    %22 = arith.mulf %19, %21 : vector<64x256xf32>
    %23 = vector.extract_strided_slice %0 {offsets = [0, 1], sizes = [64, 1], strides = [1, 1]} : vector<64x9xf32> to vector<64x1xf32>
    %24 = vector.broadcast %23 : vector<64x1xf32> to vector<64x256xf32>
    %25 = arith.mulf %24, %22 : vector<64x256xf32>
    %26 = arith.addf %16, %25 : vector<64x256xf32>
    %cst_7 = arith.constant 0.000000e+00 : f32
    %27 = vector.broadcast %cst_7 : f32 to vector<64x15xf32>
    %28 = vector.extract_strided_slice %3 {offsets = [0, 0], sizes = [64, 241], strides = [1, 1]} : vector<64x256xf32> to vector<64x241xf32>
    %29 = tpu.concatenate %27, %28 in 1 : vector<64x15xf32>, vector<64x241xf32> -> vector<64x256xf32>
    %30 = vector.extract_strided_slice %1 {offsets = [2, 0], sizes = [1, 256], strides = [1, 1]} : vector<9x256xf32> to vector<1x256xf32>
    %31 = vector.broadcast %30 : vector<1x256xf32> to vector<64x256xf32>
    %32 = arith.mulf %29, %31 : vector<64x256xf32>
    %33 = vector.extract_strided_slice %0 {offsets = [0, 2], sizes = [64, 1], strides = [1, 1]} : vector<64x9xf32> to vector<64x1xf32>
    %34 = vector.broadcast %33 : vector<64x1xf32> to vector<64x256xf32>
    %35 = arith.mulf %34, %32 : vector<64x256xf32>
    %36 = arith.addf %26, %35 : vector<64x256xf32>
    %cst_8 = arith.constant 0.000000e+00 : f32
    %37 = vector.broadcast %cst_8 : f32 to vector<64x1xf32>
    %38 = vector.extract_strided_slice %3 {offsets = [0, 0], sizes = [64, 255], strides = [1, 1]} : vector<64x256xf32> to vector<64x255xf32>
    %39 = tpu.concatenate %37, %38 in 1 : vector<64x1xf32>, vector<64x255xf32> -> vector<64x256xf32>
    %40 = vector.extract_strided_slice %1 {offsets = [3, 0], sizes = [1, 256], strides = [1, 1]} : vector<9x256xf32> to vector<1x256xf32>
    %41 = vector.broadcast %40 : vector<1x256xf32> to vector<64x256xf32>
    %42 = arith.mulf %39, %41 : vector<64x256xf32>
    %43 = vector.extract_strided_slice %0 {offsets = [0, 3], sizes = [64, 1], strides = [1, 1]} : vector<64x9xf32> to vector<64x1xf32>
    %44 = vector.broadcast %43 : vector<64x1xf32> to vector<64x256xf32>
    %45 = arith.mulf %44, %42 : vector<64x256xf32>
    %46 = arith.addf %36, %45 : vector<64x256xf32>
    %cst_9 = arith.constant 0.000000e+00 : f32
    %47 = vector.broadcast %cst_9 : f32 to vector<64x1xf32>
    %48 = vector.extract_strided_slice %3 {offsets = [0, 1], sizes = [64, 255], strides = [1, 1]} : vector<64x256xf32> to vector<64x255xf32>
    %49 = tpu.concatenate %48, %47 in 1 : vector<64x255xf32>, vector<64x1xf32> -> vector<64x256xf32>
    %50 = vector.extract_strided_slice %1 {offsets = [5, 0], sizes = [1, 256], strides = [1, 1]} : vector<9x256xf32> to vector<1x256xf32>
    %51 = vector.broadcast %50 : vector<1x256xf32> to vector<64x256xf32>
    %52 = arith.mulf %49, %51 : vector<64x256xf32>
    %53 = vector.extract_strided_slice %0 {offsets = [0, 5], sizes = [64, 1], strides = [1, 1]} : vector<64x9xf32> to vector<64x1xf32>
    %54 = vector.broadcast %53 : vector<64x1xf32> to vector<64x256xf32>
    %55 = arith.mulf %54, %52 : vector<64x256xf32>
    %56 = arith.addf %46, %55 : vector<64x256xf32>
    %cst_10 = arith.constant 0.000000e+00 : f32
    %57 = vector.broadcast %cst_10 : f32 to vector<64x15xf32>
    %58 = vector.extract_strided_slice %3 {offsets = [0, 15], sizes = [64, 241], strides = [1, 1]} : vector<64x256xf32> to vector<64x241xf32>
    %59 = tpu.concatenate %58, %57 in 1 : vector<64x241xf32>, vector<64x15xf32> -> vector<64x256xf32>
    %60 = vector.extract_strided_slice %1 {offsets = [6, 0], sizes = [1, 256], strides = [1, 1]} : vector<9x256xf32> to vector<1x256xf32>
    %61 = vector.broadcast %60 : vector<1x256xf32> to vector<64x256xf32>
    %62 = arith.mulf %59, %61 : vector<64x256xf32>
    %63 = vector.extract_strided_slice %0 {offsets = [0, 6], sizes = [64, 1], strides = [1, 1]} : vector<64x9xf32> to vector<64x1xf32>
    %64 = vector.broadcast %63 : vector<64x1xf32> to vector<64x256xf32>
    %65 = arith.mulf %64, %62 : vector<64x256xf32>
    %66 = arith.addf %56, %65 : vector<64x256xf32>
    %cst_11 = arith.constant 0.000000e+00 : f32
    %67 = vector.broadcast %cst_11 : f32 to vector<64x16xf32>
    %68 = vector.extract_strided_slice %3 {offsets = [0, 16], sizes = [64, 240], strides = [1, 1]} : vector<64x256xf32> to vector<64x240xf32>
    %69 = tpu.concatenate %68, %67 in 1 : vector<64x240xf32>, vector<64x16xf32> -> vector<64x256xf32>
    %70 = vector.extract_strided_slice %1 {offsets = [7, 0], sizes = [1, 256], strides = [1, 1]} : vector<9x256xf32> to vector<1x256xf32>
    %71 = vector.broadcast %70 : vector<1x256xf32> to vector<64x256xf32>
    %72 = arith.mulf %69, %71 : vector<64x256xf32>
    %73 = vector.extract_strided_slice %0 {offsets = [0, 7], sizes = [64, 1], strides = [1, 1]} : vector<64x9xf32> to vector<64x1xf32>
    %74 = vector.broadcast %73 : vector<64x1xf32> to vector<64x256xf32>
    %75 = arith.mulf %74, %72 : vector<64x256xf32>
    %76 = arith.addf %66, %75 : vector<64x256xf32>
    %cst_12 = arith.constant 0.000000e+00 : f32
    %77 = vector.broadcast %cst_12 : f32 to vector<64x17xf32>
    %78 = vector.extract_strided_slice %3 {offsets = [0, 17], sizes = [64, 239], strides = [1, 1]} : vector<64x256xf32> to vector<64x239xf32>
    %79 = tpu.concatenate %78, %77 in 1 : vector<64x239xf32>, vector<64x17xf32> -> vector<64x256xf32>
    %80 = vector.extract_strided_slice %1 {offsets = [8, 0], sizes = [1, 256], strides = [1, 1]} : vector<9x256xf32> to vector<1x256xf32>
    %81 = vector.broadcast %80 : vector<1x256xf32> to vector<64x256xf32>
    %82 = arith.mulf %79, %81 : vector<64x256xf32>
    %83 = vector.extract_strided_slice %0 {offsets = [0, 8], sizes = [64, 1], strides = [1, 1]} : vector<64x9xf32> to vector<64x1xf32>
    %84 = vector.broadcast %83 : vector<64x1xf32> to vector<64x256xf32>
    %85 = arith.mulf %84, %82 : vector<64x256xf32>
    %86 = arith.addf %76, %85 : vector<64x256xf32>
    %c0_13 = arith.constant 0 : index
    %c0_14 = arith.constant 0 : index
    %87 = vector.load %arg4[%c0_13, %c0_14] : memref<128x64xbf16, #tpu.memory_space<vmem>>, vector<128x64xbf16>
    %88 = arith.truncf %86 : vector<64x256xf32> to vector<64x256xbf16>
    %cst_15 = arith.constant dense<0.000000e+00> : vector<128x256xf32>
    %89 = tpu.matmul %87, %88, %cst_15 {dimension_numbers = #tpu.dot_dimension_numbers<[1], [0], [0], [1], [0, 0, 1, 1], [], []>} : vector<128x64xbf16>, vector<64x256xbf16>, vector<128x256xf32> -> vector<128x256xf32>
    %c0_16 = arith.constant 0 : index
    %c0_17 = arith.constant 0 : index
    %90 = vector.load %arg5[%c0_16, %c0_17] : memref<128x1xf32, #tpu.memory_space<vmem>>, vector<128x1xf32>
    %91 = vector.broadcast %90 : vector<128x1xf32> to vector<128x256xf32>
    %92 = arith.addf %89, %91 : vector<128x256xf32>
    %cst_18 = arith.constant 0.000000e+00 : f32
    %93 = vector.broadcast %cst_18 : f32 to vector<128x256xf32>
    %94 = arith.maximumf %92, %93 : vector<128x256xf32>
    %c0_19 = arith.constant 0 : index
    %c0_20 = arith.constant 0 : index
    %95 = vector.load %arg6[%c0_19, %c0_20] : memref<64x128xbf16, #tpu.memory_space<vmem>>, vector<64x128xbf16>
    %96 = arith.truncf %94 : vector<128x256xf32> to vector<128x256xbf16>
    %cst_21 = arith.constant dense<0.000000e+00> : vector<64x256xf32>
    %97 = tpu.matmul %95, %96, %cst_21 {dimension_numbers = #tpu.dot_dimension_numbers<[1], [0], [0], [1], [0, 0, 1, 1], [], []>} : vector<64x128xbf16>, vector<128x256xbf16>, vector<64x256xf32> -> vector<64x256xf32>
    %c0_22 = arith.constant 0 : index
    %c0_23 = arith.constant 0 : index
    %98 = vector.load %arg7[%c0_22, %c0_23] : memref<64x1xf32, #tpu.memory_space<vmem>>, vector<64x1xf32>
    %99 = vector.broadcast %98 : vector<64x1xf32> to vector<64x256xf32>
    %100 = arith.addf %97, %99 : vector<64x256xf32>
    %101 = arith.addf %100, %3 : vector<64x256xf32>
    %cst_24 = arith.constant 0.000000e+00 : f32
    %102 = vector.broadcast %cst_24 : f32 to vector<64x256xf32>
    %103 = arith.maximumf %101, %102 : vector<64x256xf32>
    %c0_25 = arith.constant 0 : index
    %c0_26 = arith.constant 0 : index
    %c0_27 = arith.constant 0 : index
    %104 = vector.load %arg8[%c0_25, %c0_26, %c0_27] : memref<1x64x256xf32, #tpu.memory_space<vmem>>, vector<1x64x256xf32>
    %105 = vector.shape_cast %104 : vector<1x64x256xf32> to vector<64x256xf32>
    %106 = vector.shape_cast %103 : vector<64x256xf32> to vector<1x64x256xf32>
    tpu.vector_store %arg8[%c0_25, %c0_26, %c0_27], %106 {strides = array<i32>} : memref<1x64x256xf32, #tpu.memory_space<vmem>>, vector<1x64x256xf32>,
    return
  }
  func.func @transform_0(%arg0: i32) -> (i32, i32, i32) {
    %c0_i32 = arith.constant 0 : i32
    %c0_i32_0 = arith.constant 0 : i32
    %c0_i32_1 = arith.constant 0 : i32
    return %arg0, %c0_i32, %c0_i32_0 : i32, i32, i32
  }
  func.func @transform_1(%arg0: i32) -> (i32, i32) {
    %c0_i32 = arith.constant 0 : i32
    %c0_i32_0 = arith.constant 0 : i32
    %c0_i32_1 = arith.constant 0 : i32
    return %c0_i32, %c0_i32_0 : i32, i32
  }
  func.func @transform_2(%arg0: i32) -> (i32, i32) {
    %c0_i32 = arith.constant 0 : i32
    %c0_i32_0 = arith.constant 0 : i32
    %c0_i32_1 = arith.constant 0 : i32
    return %c0_i32, %c0_i32_0 : i32, i32
  }
  func.func @transform_3(%arg0: i32) -> (i32, i32) {
    %c0_i32 = arith.constant 0 : i32
    %c0_i32_0 = arith.constant 0 : i32
    %c0_i32_1 = arith.constant 0 : i32
    return %c0_i32, %c0_i32_0 : i32, i32
  }
  func.func @transform_4(%arg0: i32) -> (i32, i32) {
    %c0_i32 = arith.constant 0 : i32
    %c0_i32_0 = arith.constant 0 : i32
    %c0_i32_1 = arith.constant 0 : i32
    return %c0_i32, %c0_i32_0 : i32, i32
  }
  func.func @transform_5(%arg0: i32) -> (i32, i32) {
    %c0_i32 = arith.constant 0 : i32
    %c0_i32_0 = arith.constant 0 : i32
    %c0_i32_1 = arith.constant 0 : i32
    return %c0_i32, %c0_i32_0 : i32, i32
  }
  func.func @transform_6(%arg0: i32) -> (i32, i32) {
    %c0_i32 = arith.constant 0 : i32
    %c0_i32_0 = arith.constant 0 : i32
    %c0_i32_1 = arith.constant 0 : i32
    return %c0_i32, %c0_i32_0 : i32, i32
  }
  func.func @transform_7(%arg0: i32) -> (i32, i32, i32) {
    %c0_i32 = arith.constant 0 : i32
    %c0_i32_0 = arith.constant 0 : i32
    %c0_i32_1 = arith.constant 0 : i32
    return %arg0, %c0_i32, %c0_i32_0 : i32, i32, i32
  }
}

</mosaic_0001>

<bundles_post_ra>
// kernel: tpu_custom_call.1
= control target key start
LH: loop header
LB: loop body
LE: loop exit
PB: predicated region body
PF: predicated region fallthrough
CT: control target
= control target key end

     0   :  { %12 = vsyncpa [#allocation3], 0  ;;  %s4249_s0 = inlined_call_operand.vmem [shape: f32[2,64,256], index: 0, kind: input, shape index: {}]   ;;  %s4250_s1 = inlined_call_operand.vmem [shape: f32[64,9], index: 1, kind: input, shape index: {}]   ;;  %s4251_s2 = inlined_call_operand.vmem [shape: f32[9,256], index: 2, kind: input, shape index: {}]   ;;  %s4252_s3 = inlined_call_operand.vmem [shape: bf16[128,64], index: 3, kind: input, shape index: {}]   ;;  %s4253_s4 = inlined_call_operand.vmem [shape: f32[128,1], index: 4, kind: input, shape index: {}]   ;;  %s4254_s5 = inlined_call_operand.vmem [shape: bf16[64,128], index: 5, kind: input, shape index: {}]   ;;  %s4255_s6 = inlined_call_operand.vmem [shape: f32[64,1], index: 6, kind: input, shape index: {}]   ;;  %s4256_s7 = inlined_call_operand.hbm [shape: f32[2,64,256], index: 7, kind: output, shape index: {}]  }
   0x1   :  { %14 = vsyncpa [#allocation3 + $0x1], 0  ;;  %s2504_s24 = smov 0   ;;  %s2506_s25 = smov 0  }
   0x2   :  { %s2508_s26 = smov 0   ;;  %s2510_s27 = smov 0  }
   0x3 LB: > { %s2525_s28 = sadd.s32 4294967295, %s2444_s27   ;;  %s2149_s29 = sadd.s32 4294967294, %s2444_s27   ;;  %s2444_s27 = sphi %s2510_s27, %s4438_s27   ;;  %s2440_s26 = sphi %s2508_s26, %s4437_s26   ;;  %s2436_s25 = sphi %s2506_s25, %s4436_s25   ;;  %s2432_s24 = sphi %s2504_s24, %s4435_s24  }
   0x4   : > { %s2529_s30 = sadd.s32 1, %s2444_s27   ;;  %s179_s8 = sadd.s32 1, %s2440_s26 }
   0x5   : > { %s176_s9 = ssub.s32 %s2444_s27, %s2529_s30  ;;  %p189_p0 = scmp.ne.s32.totalorder %s2440_s26, %s2436_s25 }
   0x6   : > { %p177_p1 = scmp.eq.s32.totalorder %s176_s9, 0  ;;  %p190_p2 = scmp.eq.s32.totalorder %s2525_s28, 1 }
   0x7   : > { %p195_p3 = scmp.ne.s32.totalorder %s2436_s25, %s2432_s24  ;;  %p196_p4 = scmp.eq.s32.totalorder %s2149_s29, 1 }
   0x8   : > { %s2540_s10 = scalar_select %p177_p1, %s2440_s26, %s179_s8  }
   0x9   : > { %p2542_p5 = por %p190_p2, %p189_p0  ;;  %p2546_p6 = por %p196_p4, %p195_p3 }
   0xa   : > { %p2152_p7 = scmp.ge.s32.totalorder %s2444_s27, 1  ;;  %p240_p8 = scmp.lt.s32.totalorder %s2444_s27, 3 }
   0xc   : > { %p241_p9 = pnand %p2152_p7, %p240_p8 }
   0xe   : > { %244 = sbr.rel (%p241_p9) target bundleno = 1193 (0x4a9), region = 48 }
  0x13   : > { %v2555_v0 = vld [vmem:[%s4250_s1 + $0x20] sm:$0xff]  ;;  %v2560_v1 = vld [vmem:[%s4250_s1 + $0x10] sm:$0xff]  ;;  %v2446_v3 = vmov 4   ;;  %p272_p10 = scmp.lt.s32.totalorder %s2525_s28, 1  ;;  %v2575_v4 = vld [vmem:[%s4250_s1 + $0x28] sm:$0xff]  ;;  %s2447_s20 = smov 17  }
  0x14   : > { %4313 = vst [vmem:[#allocation5_spill] sm:$0xff] %v2555_v0  ;;  %v2565_v2 = vld [vmem:[%s4250_s1] sm:$0xff]  ;;  %2298 = vset.pattern.permute.xlu2 %v2446_v3  ;;  %2297 = vset.pattern.permute.xlu1 %v2446_v3  ;;  %v2580_v5 = vld [vmem:[%s4250_s1 + $0x18] sm:$0xff]  ;;  %v2585_v6 = vld [vmem:[%s4250_s1 + $0x8] sm:$0xff]  ;;  %v4257_v13 = vmov 0   ;;  %s2449_s21 = smov 16  }
  0x15   : > { %2296 = vset.pattern.permute.xlu0 %v2446_v3  ;;  %328 = vperm.xlu2 %2298, %v2555_v0   ;;  %s273_s19 = scalar_select %p272_p10, %s2525_s28, 1  ;;  %v2601_v8 = vld [vmem:[%s4250_s1 + $0x38] sm:$0xff]  ;;  %v2606_v9 = vld [vmem:[%s4250_s1 + $0x30] sm:$0xff]  ;;  %v2450_v27 = vmov 1   ;;  %v2452_v45 = vmov 2   ;;  %v2821_v55 = vld [vmem:[%s4251_s2] sm:$0xff] }
  0x16   : > { %318 = vperm.xlu1 %2297, %v2560_v1   ;;  %308 = vperm.xlu0 %2296, %v2565_v2   ;;  %s2451_s22 = smov 15   ;;  %vm557_vm0 = vcmask 130048   ;;  %v2828_v59 = vperm.slane %v2821_v55, 1  ;;  %s2453_s13 = smov 1   ;;  %vm410_vm1 = vcmask 138240   ;;  %vm704_vm2 = vcmask 121856  }
  0x17   : > { %s2225_s9 = sshll.u32 %s273_s19, 7  ;;  %s2455_s14 = smov 127   ;;  %vm851_vm3 = vcmask 7168   ;;  %vm998_vm4 = vcmask 1039360   ;;  %vm1145_vm5 = vcmask 924672   ;;  %vm1292_vm6 = vcmask 916480  }
  0x18   : > { %s2593_s15 = scalar_lea.vmem %s4249_s0, %s2225_s9  ;;  %4329 = vst [vmem:[#allocation21_spill] sm:$0xff] %v2828_v59  ;;  %s2456_s16 = smov 113   ;;  %vm1439_vm7 = vcmask 908288   ;;  %vm1714_vm8 = vcmask 523264  }
  0x19   : > { %v2596_v7 = vld [vmem:[%s2593_s15] sm:$0xff]  ;;  %v2613_v10 = vld [vmem:[%s2593_s15 + $0x18] sm:$0xff]  ;;  %v2616_v11 = vld [vmem:[%s2593_s15 + $0x10] sm:$0xff]  ;;  %s2458_s17 = smov 112   ;;  %s2459_s18 = smov 111  }
  0x1a   : > { %4314 = vst [vmem:[#allocation6_spill] sm:$0xff] %v2613_v10  ;;  %v2619_v12 = vld [vmem:[%s2593_s15 + $0x8] sm:$0xff]  ;;  %v2631_v14 = vld [vmem:[%s2593_s15 + $0x30] sm:$0xff]  ;;  %v2637_v16 = vld [vmem:[%s2593_s15 + $0x20] sm:$0xff] }
  0x1b   : > { %v2634_v15 = vld [vmem:[%s2593_s15 + $0x28] sm:$0xff]  ;;  %v2649_v18 = vld [vmem:[%s2593_s15 + $0x40] sm:$0xff]  ;;  %v2652_v19 = vld [vmem:[%s2593_s15 + $0x38] sm:$0xff] }
  0x1c   : > { %4315 = vst [vmem:[#allocation7_spill] sm:$0xff] %v2634_v15  ;;  %v2646_v17 = vld [vmem:[%s2593_s15 + $0x48] sm:$0xff]  ;;  %v2661_v20 = vld [vmem:[%s2593_s15 + $0x60] sm:$0xff]  ;;  %v2664_v21 = vld [vmem:[%s2593_s15 + $0x58] sm:$0xff] }
  0x1d   : > { %333 = vperm.xlu2 %2298, %v2575_v4   ;;  %4316 = vst [vmem:[#allocation8_spill] sm:$0xff] %v2652_v19  ;;  %v2667_v22 = vld [vmem:[%s2593_s15 + $0x50] sm:$0xff]  ;;  %v2676_v23 = vld [vmem:[%s2593_s15 + $0x78] sm:$0xff]  ;;  %v2682_v25 = vld [vmem:[%s2593_s15 + $0x68] sm:$0xff] }
  0x1e   : > { %323 = vperm.xlu1 %2297, %v2580_v5   ;;  %313 = vperm.xlu0 %2296, %v2585_v6   ;;  %v2679_v24 = vld [vmem:[%s2593_s15 + $0x70] sm:$0xff] }
  0x25   : > { %378 = vrot.lane.b32.xlu2 %v2596_v7, %s2447_s20 }
  0x26   : > { %343 = vperm.xlu1 %2297, %v2601_v8   ;;  %338 = vperm.xlu0 %2296, %v2606_v9  }
  0x27   : > { %2301 = vset.pattern.permute.xlu2 %v4257_v13 }
  0x2d   : > { %384 = vrot.lane.b32.xlu2 %v2613_v10, %s2447_s20 }
  0x2e   : > { %382 = vrot.lane.b32.xlu1 %v2616_v11, %s2447_s20  ;;  %380 = vrot.lane.b32.xlu0 %v2619_v12, %s2447_s20 }
  0x2f   : > { %2300 = vset.pattern.permute.xlu1 %v4257_v13  ;;  %2299 = vset.pattern.permute.xlu0 %v4257_v13 }
  0x35   : > { %390 = vrot.lane.b32.xlu2 %v2631_v14, %s2447_s20 }
  0x36   : > { %388 = vrot.lane.b32.xlu1 %v2634_v15, %s2447_s20  ;;  %386 = vrot.lane.b32.xlu0 %v2637_v16, %s2447_s20 }
  0x3d   : > { %396 = vrot.lane.b32.xlu2 %v2646_v17, %s2447_s20 }
  0x3e   : > { %394 = vrot.lane.b32.xlu1 %v2649_v18, %s2447_s20  ;;  %392 = vrot.lane.b32.xlu0 %v2652_v19, %s2447_s20 }
  0x45   : > { %402 = vrot.lane.b32.xlu2 %v2661_v20, %s2447_s20 }
  0x46   : > { %400 = vrot.lane.b32.xlu1 %v2664_v21, %s2447_s20  ;;  %398 = vrot.lane.b32.xlu0 %v2667_v22, %s2447_s20 }
  0x4d   : > { %408 = vrot.lane.b32.xlu2 %v2676_v23, %s2447_s20 }
  0x4e   : > { %406 = vrot.lane.b32.xlu1 %v2679_v24, %s2447_s20  ;;  %404 = vrot.lane.b32.xlu0 %v2682_v25, %s2447_s20 }
  0x55   : > { %470 = vperm.xlu2 %2301, %v2560_v1  }
  0x56   : > { %466 = vperm.xlu1 %2300, %v2585_v6   ;;  %462 = vperm.xlu0 %2299, %v2565_v2  }
  0x5d   : > { %478 = vperm.xlu2 %2301, %v2555_v0  }
  0x5e   : > { %474 = vperm.xlu1 %2300, %v2580_v5   ;;  %482 = vperm.xlu0 %2299, %v2575_v4  }
  0x65   : > { %490 = vperm.xlu2 %2301, %v2601_v8  }
  0x66   : > { %486 = vperm.xlu1 %2300, %v2606_v9   ;;  %525 = vrot.lane.b32.xlu0 %v2596_v7, %s2449_s21 }
  0x67   : > { %2304 = vset.pattern.permute.xlu0 %v2450_v27 }
  0x6d   : > { %529 = vrot.lane.b32.xlu2 %v2616_v11, %s2449_s21 }
  0x6e   : > { %527 = vrot.lane.b32.xlu1 %v2619_v12, %s2449_s21  ;;  %531 = vrot.lane.b32.xlu0 %v2613_v10, %s2449_s21 }
  0x6f   : > { %v2706_v26 = vpop.permute.xlu2 %328  ;;  %2302 = vset.pattern.permute.xlu1 %v2450_v27  ;;  %2303 = vset.pattern.permute.xlu2 %v2450_v27 }
  0x70   : > { %4317 = vst [vmem:[#allocation9_spill] sm:$0xff] %v2706_v26  ;;  %v4267_v26 = vmov 3  }
  0x75   : > { %535 = vrot.lane.b32.xlu2 %v2634_v15, %s2449_s21 }
  0x76   : > { %533 = vrot.lane.b32.xlu1 %v2637_v16, %s2449_s21  ;;  %537 = vrot.lane.b32.xlu0 %v2631_v14, %s2449_s21 }
  0x77   : > { %v2714_v28 = vpop.permute.xlu2 %333 }
  0x78   : > { %4318 = vst [vmem:[#allocation10_spill] sm:$0xff] %v2714_v28 }
  0x7d   : > { %541 = vrot.lane.b32.xlu2 %v2649_v18, %s2449_s21 }
  0x7e   : > { %539 = vrot.lane.b32.xlu1 %v2652_v19, %s2449_s21  ;;  %543 = vrot.lane.b32.xlu0 %v2646_v17, %s2449_s21 }
  0x7f   : > { %v2722_v29 = vpop.permute.xlu2 %378 }
  0x85   : > { %547 = vrot.lane.b32.xlu2 %v2664_v21, %s2449_s21 }
  0x86   : > { %545 = vrot.lane.b32.xlu1 %v2667_v22, %s2449_s21  ;;  %549 = vrot.lane.b32.xlu0 %v2661_v20, %s2449_s21 }
  0x87   : > { %v2730_v30 = vpop.permute.xlu2 %384 }
  0x88   : > { %v2732_v31 = vpop.permute.xlu1 %318  ;;  %v2734_v32 = vpop.permute.xlu0 %308 }
  0x8d   : > { %553 = vrot.lane.b32.xlu2 %v2679_v24, %s2449_s21 }
  0x8e   : > { %551 = vrot.lane.b32.xlu1 %v2682_v25, %s2449_s21  ;;  %555 = vrot.lane.b32.xlu0 %v2676_v23, %s2449_s21 }
  0x8f   : > { %v2742_v33 = vpop.permute.xlu2 %390 }
  0x90   : > { %v2744_v34 = vpop.permute.xlu1 %323  ;;  %v2746_v35 = vpop.permute.xlu0 %313 }
  0x95   : > { %613 = vperm.xlu2 %2303, %v2585_v6  }
  0x96   : > { %609 = vperm.xlu1 %2302, %v2565_v2   ;;  %617 = vperm.xlu0 %2304, %v2560_v1  }
  0x97   : > { %v2751_v36 = vpop.permute.xlu2 %396 }
  0x98   : > { %4319 = vst [vmem:[#allocation11_spill] sm:$0xff] %v2751_v36  ;;  %v2753_v37 = vpop.permute.xlu1 %343  ;;  %v2755_v38 = vpop.permute.xlu0 %338 }
  0x99   : > { %4320 = vst [vmem:[#allocation12_spill] sm:$0xff] %v2753_v37 }
  0x9a   : > { %4321 = vst [vmem:[#allocation13_spill] sm:$0xff] %v2755_v38 }
  0x9d   : > { %625 = vperm.xlu2 %2303, %v2555_v0  }
  0x9e   : > { %621 = vperm.xlu1 %2302, %v2580_v5   ;;  %637 = vperm.xlu0 %2304, %v2601_v8  }
  0x9f   : > { %v2760_v39 = vpop.permute.xlu2 %402 }
  0xa0   : > { %4322 = vst [vmem:[#allocation14_spill] sm:$0xff] %v2760_v39  ;;  %v2762_v40 = vpop.permute.xlu1 %382  ;;  %v2764_v41 = vpop.permute.xlu0 %380 }
  0xa5   : > { %633 = vperm.xlu2 %2303, %v2606_v9  }
  0xa6   : > { %629 = vperm.xlu1 %2302, %v2575_v4   ;;  %676 = vrot.lane.b32.xlu0 %v2616_v11, %s2451_s22 }
  0xa7   : > { %v2770_v42 = vpop.permute.xlu2 %408  ;;  %2306 = vset.pattern.permute.xlu0 %v2452_v45 }
  0xa8   : > { %v2772_v43 = vpop.permute.xlu1 %388  ;;  %v2774_v44 = vpop.permute.xlu0 %386 }
  0xad   : > { %674 = vrot.lane.b32.xlu2 %v2619_v12, %s2451_s22 }
  0xae   : > { %672 = vrot.lane.b32.xlu1 %v2596_v7, %s2451_s22  ;;  %682 = vrot.lane.b32.xlu0 %v2634_v15, %s2451_s22 }
  0xaf   : > { %v2782_v46 = vpop.permute.xlu2 %470  ;;  %2305 = vset.pattern.permute.xlu2 %v2452_v45  ;;  %2307 = vset.pattern.permute.xlu1 %v2452_v45 }
  0xb0   : > { %v2784_v47 = vpop.permute.xlu1 %394  ;;  %v2786_v48 = vpop.permute.xlu0 %392 }
  0xb1   : > { %4323 = vst [vmem:[#allocation15_spill] sm:$0xff] %v2784_v47 }
  0xb5   : > { %680 = vrot.lane.b32.xlu2 %v2637_v16, %s2451_s22 }
  0xb6   : > { %678 = vrot.lane.b32.xlu1 %v2613_v10, %s2451_s22  ;;  %688 = vrot.lane.b32.xlu0 %v2649_v18, %s2451_s22 }
  0xb7   : > { %v2794_v49 = vpop.permute.xlu2 %478 }
  0xb8   : > { %4324 = vst [vmem:[#allocation16_spill] sm:$0xff] %v2794_v49  ;;  %v2796_v50 = vpop.permute.xlu1 %400  ;;  %v2798_v51 = vpop.permute.xlu0 %398 }
  0xb9   : > { %4325 = vst [vmem:[#allocation17_spill] sm:$0xff] %v2796_v50 }
  0xba   : > { %4326 = vst [vmem:[#allocation18_spill] sm:$0xff] %v2798_v51 }
  0xbd   : > { %686 = vrot.lane.b32.xlu2 %v2652_v19, %s2451_s22 }
  0xbe   : > { %684 = vrot.lane.b32.xlu1 %v2631_v14, %s2451_s22  ;;  %694 = vrot.lane.b32.xlu0 %v2664_v21, %s2451_s22 }
  0xbf   : > { %v2806_v52 = vpop.permute.xlu2 %490 }
  0xc0   : > { %4327 = vst [vmem:[#allocation19_spill] sm:$0xff] %v2806_v52  ;;  %v2808_v53 = vpop.permute.xlu1 %406  ;;  %v2810_v54 = vpop.permute.xlu0 %404 }
  0xc1   : > { %4328 = vst [vmem:[#allocation20_spill] sm:$0xff] %v2810_v54 }
  0xc5   : > { %692 = vrot.lane.b32.xlu2 %v2667_v22, %s2451_s22 }
  0xc6   : > { %690 = vrot.lane.b32.xlu1 %v2646_v17, %s2451_s22  ;;  %700 = vrot.lane.b32.xlu0 %v2679_v24, %s2451_s22 }
  0xc7   : > { %v530_v56 = vpop.permute.xlu2 %529 }
  0xc8   : > { %v2823_v57 = vpop.permute.xlu1 %466  ;;  %v2825_v58 = vpop.permute.xlu0 %462  ;;  %v583_v60 = vsel %vm557_vm0, 0.0, %v530_v56 }
  0xc9   : > { %v2832_v61 = vmul.f32 %v2828_v59, %v583_v60 }
  0xcd   : > { %698 = vrot.lane.b32.xlu2 %v2682_v25, %s2451_s22 }
  0xce   : > { %696 = vrot.lane.b32.xlu1 %v2661_v20, %s2451_s22  ;;  %760 = vperm.xlu0 %2306, %v2585_v6  }
  0xcf   : > { %v536_v62 = vpop.permute.xlu2 %535 }
  0xd0   : > { %v2839_v63 = vpop.permute.xlu1 %474  ;;  %v2841_v3 = vpop.permute.xlu0 %482 }
  0xd1   : > { %4330 = vst [vmem:[#allocation22_spill] sm:$0xff] %v2841_v3  ;;  %v2858_v3 = vld [vmem:[%s4251_s2 + $0x8] sm:$0xff] }
  0xd2   : > { %v2865_v51 = vperm.slane %v2858_v3, 1  ;;  %v2878_v36 = vperm.slane %v2858_v3, 0 }
  0xd4   : > { %4333 = vst [vmem:[#allocation25_spill] sm:$0xff] %v2865_v51 }
  0xd5   : > { %756 = vperm.xlu2 %2305, %v2565_v2   ;;  %4335 = vst [vmem:[#allocation27_spill] sm:$0xff] %v2878_v36 }
  0xd6   : > { %702 = vrot.lane.b32.xlu1 %v2676_v23, %s2451_s22  ;;  %780 = vperm.xlu0 %2306, %v2606_v9  }
  0xd7   : > { %v2847_v27 = vpop.permute.xlu2 %541 }
  0xd8   : > { %4331 = vst [vmem:[#allocation23_spill] sm:$0xff] %v2847_v27  ;;  %v2849_v45 = vpop.permute.xlu1 %486  ;;  %v526_v60 = vpop.permute.xlu0 %525 }
  0xd9   : > { %4332 = vst [vmem:[#allocation24_spill] sm:$0xff] %v2849_v45  ;;  %v582_v13 = vsel %vm557_vm0, 0.0, %v526_v60 }
  0xda   : > { %v2853_v28 = vmul.f32 %v2828_v59, %v582_v13 }
  0xdd   : > { %768 = vperm.xlu2 %2305, %v2580_v5  }
  0xde   : > { %764 = vperm.xlu1 %2307, %v2560_v1   ;;  %821 = vrot.lane.b32.xlu0 %v2619_v12, %s2453_s13 }
  0xdf   : > { %v2867_v50 = vpop.permute.xlu2 %547  ;;  %2308 = vset.pattern.permute.xlu0 %v4267_v26 }
  0xe0   : > { %4334 = vst [vmem:[#allocation26_spill] sm:$0xff] %v2867_v50  ;;  %v528_v13 = vpop.permute.xlu1 %527  ;;  %v532_v45 = vpop.permute.xlu0 %531 }
  0xe1   : > { %v558_v38 = vsel %vm557_vm0, %v526_v60, %v528_v13  ;;  %v559_v54 = vsel %vm557_vm0, %v530_v56, %v532_v45 }
  0xe2   : > { %v2872_v39 = vmul.f32 %v2865_v51, %v558_v38  ;;  %v595_v49 = vmul.f32 %v2865_v51, %v559_v54  ;;  %v412_v38 = vsel %vm410_vm1, %v2762_v40, %v2730_v30  ;;  %v349_v30 = vmul.f32 %v2746_v35, %v2613_v10 }
  0xe3   : > { %v448_v50 = vmul.f32 %v2878_v36, %v412_v38  ;;  %v4337_v38 = vmov 3  }
  0xe5   : > { %776 = vperm.xlu2 %2305, %v2575_v4   ;;  %v496_v52 = vmul.f32 %v2823_v57, %v448_v50 }
  0xe6   : > { %772 = vperm.xlu1 %2307, %v2555_v0   ;;  %827 = vrot.lane.b32.xlu0 %v2637_v16, %s2453_s13 }
  0xe7   : > { %v2886_v56 = vpop.permute.xlu2 %553 }
  0xe8   : > { %4336 = vst [vmem:[#allocation28_spill] sm:$0xff] %v2886_v56  ;;  %v534_v54 = vpop.permute.xlu1 %533  ;;  %v538_v45 = vpop.permute.xlu0 %537 }
  0xe9   : > { %v560_v60 = vsel %vm557_vm0, %v534_v54, %v536_v62  ;;  %v584_v13 = vsel %vm557_vm0, 0.0, %v534_v54  ;;  %v585_v26 = vsel %vm557_vm0, 0.0, %v538_v45  ;;  %v512_v54 = vadd.f32 %v496_v52, %v349_v30 }
  0xea   : > { %v2893_v27 = vmul.f32 %v2828_v59, %v584_v13  ;;  %v597_v47 = vmul.f32 %v2865_v51, %v560_v60  ;;  %v2897_v37 = vmul.f32 %v2828_v59, %v585_v26 }
  0xed   : > { %819 = vrot.lane.b32.xlu2 %v2596_v7, %s2453_s13 }
  0xee   : > { %784 = vperm.xlu1 %2307, %v2601_v8   ;;  %833 = vrot.lane.b32.xlu0 %v2652_v19, %s2453_s13 }
  0xef   : > { %v2907_v62 = vpop.permute.xlu2 %613  ;;  %2310 = vset.pattern.permute.xlu2 %v4337_v38 }
  0xf0   : > { %v540_v26 = vpop.permute.xlu1 %539  ;;  %v2910_v60 = vpop.permute.xlu0 %543  ;;  %v643_v13 = vmul.f32 %v2907_v62, %v595_v49 }
  0xf1   : > { %4338 = vst [vmem:[#allocation29_spill] sm:$0xff] %v2910_v60  ;;  %v561_v50 = vsel %vm557_vm0, %v538_v45, %v540_v26  ;;  %v413_v26 = vsel %vm410_vm1, %v2774_v44, %v2772_v43 }
  0xf2   : > { %v599_v59 = vmul.f32 %v2865_v51, %v561_v50  ;;  %v2915_v56 = vadd.f32 %v643_v13, %v512_v54  ;;  %v411_v54 = vsel %vm410_vm1, %v2722_v29, %v2764_v41  ;;  %v351_v41 = vmul.f32 %v2732_v31, %v2634_v15 }
  0xf5   : > { %825 = vrot.lane.b32.xlu2 %v2613_v10, %s2453_s13  ;;  %v347_v10 = vmul.f32 %v2734_v32, %v2619_v12  ;;  %v414_v12 = vsel %vm410_vm1, %v2742_v33, %v2786_v48 }
  0xf6   : > { %823 = vrot.lane.b32.xlu1 %v2616_v11, %s2453_s13  ;;  %839 = vrot.lane.b32.xlu0 %v2667_v22, %s2453_s13  ;;  %v452_v51 = vmul.f32 %v2878_v36, %v414_v12 }
  0xf7   : > { %v2923_v52 = vpop.permute.xlu2 %625  ;;  %2309 = vset.pattern.permute.xlu1 %v4337_v38 }
  0xf8   : > { %4339 = vst [vmem:[#allocation30_spill] sm:$0xff] %v2923_v52  ;;  %v2926_v49 = vpop.permute.xlu1 %545  ;;  %v2928_v45 = vpop.permute.xlu0 %549 }
  0xf9   : > { %4340 = vst [vmem:[#allocation31_spill] sm:$0xff] %v2926_v49  ;;  %v446_v49 = vmul.f32 %v2878_v36, %v411_v54 }
  0xfa   : > { %4341 = vst [vmem:[#allocation32_spill] sm:$0xff] %v2928_v45  ;;  %v450_v45 = vmul.f32 %v2878_v36, %v413_v26  ;;  %v4291_v36 = vmov 5  }
  0xfb   : > { %v494_v52 = vmul.f32 %v2825_v58, %v446_v49 }
  0xfd   : > { %831 = vrot.lane.b32.xlu2 %v2631_v14, %s2453_s13  ;;  %v510_v26 = vadd.f32 %v494_v52, %v347_v10  ;;  %v353_v10 = vmul.f32 %v2744_v34, %v2652_v19 }
  0xfe   : > { %829 = vrot.lane.b32.xlu1 %v2634_v15, %s2453_s13  ;;  %845 = vrot.lane.b32.xlu0 %v2682_v25, %s2453_s13  ;;  %v500_v15 = vmul.f32 %v2839_v63, %v452_v51  ;;  %v2987_v51 = vperm.slane %v2821_v55, 2 }
  0xff   : > { %v2936_v30 = vpop.permute.xlu2 %633 }
 0x100   : > { %4342 = vst [vmem:[#allocation33_spill] sm:$0xff] %v2936_v30  ;;  %v2944_v13 = vpop.permute.xlu1 %551  ;;  %v2946_v50 = vpop.permute.xlu0 %555  ;;  %v498_v30 = vmul.f32 %v2782_v46, %v450_v45  ;;  %v516_v52 = vadd.f32 %v500_v15, %v353_v10  ;;  %v3013_v10 = vperm.slane %v2858_v3, 2 }
 0x101   : > { %4343 = vst [vmem:[#allocation34_spill] sm:$0xff] %v2944_v13 }
 0x102   : > { %4344 = vst [vmem:[#allocation35_spill] sm:$0xff] %v2946_v50  ;;  %v514_v49 = vadd.f32 %v498_v30, %v351_v41 }
 0x105   : > { %837 = vrot.lane.b32.xlu2 %v2646_v17, %s2453_s13 }
 0x106   : > { %835 = vrot.lane.b32.xlu1 %v2649_v18, %s2453_s13  ;;  %903 = vperm.xlu0 %2308, %v2565_v2  }
 0x107   : > { %v675_v43 = vpop.permute.xlu2 %674 }
 0x108   : > { %v610_v54 = vpop.permute.xlu1 %609  ;;  %v2964_v45 = vpop.permute.xlu0 %617 }
 0x109   : > { %v641_v13 = vmul.f32 %v610_v54, %v2872_v39  ;;  %v645_v60 = vmul.f32 %v2964_v45, %v597_v47 }
 0x10b   : > { %v2969_v2 = vadd.f32 %v641_v13, %v510_v26  ;;  %v2971_v50 = vadd.f32 %v645_v60, %v514_v49 }
 0x10d   : > { %843 = vrot.lane.b32.xlu2 %v2661_v20, %s2453_s13 }
 0x10e   : > { %841 = vrot.lane.b32.xlu1 %v2664_v21, %s2453_s13  ;;  %990 = vrot.lane.b32.xlu0 %v2661_v20, %s2455_s14 }
 0x10f   : > { %v681_v39 = vpop.permute.xlu2 %680  ;;  %2316 = vset.pattern.permute.xlu0 %v4291_v36 }
 0x110   : > { %v2982_v47 = vpop.permute.xlu1 %621  ;;  %v2984_v48 = vpop.permute.xlu0 %637  ;;  %v731_v60 = vsel %vm704_vm2, 0.0, %v681_v39 }
 0x111   : > { %4345 = vst [vmem:[#allocation36_spill] sm:$0xff] %v2984_v48  ;;  %v647_v30 = vmul.f32 %v2982_v47, %v599_v59  ;;  %v2992_v13 = vmul.f32 %v2987_v51, %v731_v60 }
 0x113   : > { %v2994_v41 = vadd.f32 %v647_v30, %v516_v52 }
 0x115   : > { %849 = vrot.lane.b32.xlu2 %v2676_v23, %s2453_s13 }
 0x116   : > { %847 = vrot.lane.b32.xlu1 %v2679_v24, %s2453_s13  ;;  %996 = vrot.lane.b32.xlu0 %v2676_v23, %s2455_s14  ;;  %s2238_s13 = sshll.u32 %s2525_s28, 7 }
 0x117   : > { %v687_v12 = vpop.permute.xlu2 %686 }
 0x118   : > { %v3002_v49 = vpop.permute.xlu1 %629  ;;  %v677_v15 = vpop.permute.xlu0 %676 }
 0x119   : > { %4346 = vst [vmem:[#allocation37_spill] sm:$0xff] %v3002_v49  ;;  %v730_v59 = vsel %vm704_vm2, 0.0, %v677_v15 }
 0x11a   : > { %v3006_v26 = vmul.f32 %v2987_v51, %v730_v59 }
 0x11d   : > { %911 = vperm.xlu2 %2310, %v2560_v1  }
 0x11e   : > { %907 = vperm.xlu1 %2309, %v2585_v6   ;;  %1137 = vrot.lane.b32.xlu0 %v2661_v20, %s2456_s16 }
 0x11f   : > { %v3015_v60 = vpop.permute.xlu2 %692 }
 0x120   : > { %4347 = vst [vmem:[#allocation38_spill] sm:$0xff] %v3015_v60  ;;  %v673_v52 = vpop.permute.xlu1 %672  ;;  %v683_v30 = vpop.permute.xlu0 %682  ;;  %v435_v60 = vsel %vm410_vm1, 0.0, %v2722_v29  ;;  %v346_v29 = vmul.f32 %v2734_v32, %v2596_v7 }
 0x121   : > { %v705_v49 = vsel %vm704_vm2, %v673_v52, %v675_v43  ;;  %v729_v59 = vsel %vm704_vm2, 0.0, %v673_v52  ;;  %v707_v19 = vsel %vm704_vm2, %v681_v39, %v683_v30  ;;  %v3030_v43 = vperm.slane %v2821_v55, 0 }
 0x122   : > { %v739_v1 = vmul.f32 %v2987_v51, %v729_v59  ;;  %v740_v6 = vmul.f32 %v3013_v10, %v705_v49  ;;  %v3023_v48 = vmul.f32 %v3013_v10, %v707_v19 }
 0x123   : > { %v445_v19 = vmul.f32 %v3030_v43, %v435_v60 }
 0x125   : > { %919 = vperm.xlu2 %2310, %v2555_v0   ;;  %v493_v59 = vmul.f32 %v2825_v58, %v445_v19  ;;  %v438_v0 = vsel %vm410_vm1, 0.0, %v2742_v33 }
 0x126   : > { %915 = vperm.xlu1 %2309, %v2580_v5   ;;  %1143 = vrot.lane.b32.xlu0 %v2676_v23, %s2456_s16  ;;  %v640_v5 = vmul.f32 %v610_v54, %v2853_v28  ;;  %v451_v32 = vmul.f32 %v3030_v43, %v438_v0 }
 0x127   : > { %v3035_v39 = vpop.permute.xlu2 %698  ;;  %v509_v60 = vadd.f32 %v493_v59, %v346_v29 }
 0x128   : > { %4348 = vst [vmem:[#allocation39_spill] sm:$0xff] %v3035_v39  ;;  %v679_v49 = vpop.permute.xlu1 %678  ;;  %v3038_v52 = vpop.permute.xlu0 %688 }
 0x129   : > { %v706_v30 = vsel %vm704_vm2, %v677_v15, %v679_v49  ;;  %v656_v58 = vadd.f32 %v640_v5, %v509_v60  ;;  %v352_v5 = vmul.f32 %v2744_v34, %v2631_v14 }
 0x12a   : > { %v742_v36 = vmul.f32 %v3013_v10, %v706_v30  ;;  %v499_v30 = vmul.f32 %v2839_v63, %v451_v32  ;;  %v436_v63 = vsel %vm410_vm1, 0.0, %v2762_v40 }
 0x12d   : > { %994 = vrot.lane.b32.xlu2 %v2679_v24, %s2455_s14 }
 0x12e   : > { %992 = vrot.lane.b32.xlu1 %v2682_v25, %s2455_s14  ;;  %982 = vrot.lane.b32.xlu0 %v2649_v18, %s2455_s14 }
 0x12f   : > { %v757_v7 = vpop.permute.xlu2 %756 }
 0x130   : > { %v685_v15 = vpop.permute.xlu1 %684  ;;  %v3055_v19 = vpop.permute.xlu0 %694  ;;  %v787_v28 = vmul.f32 %v757_v7, %v739_v1  ;;  %v788_v54 = vmul.f32 %v757_v7, %v740_v6  ;;  %v646_v1 = vmul.f32 %v2982_v47, %v2897_v37  ;;  %v447_v37 = vmul.f32 %v3030_v43, %v436_v63 }
 0x131   : > { %4349 = vst [vmem:[#allocation40_spill] sm:$0xff] %v3055_v19  ;;  %v708_v33 = vsel %vm704_vm2, %v685_v15, %v687_v12  ;;  %v732_v49 = vsel %vm704_vm2, 0.0, %v685_v15  ;;  %v515_v12 = vadd.f32 %v499_v30, %v352_v5  ;;  %v350_v63 = vmul.f32 %v2732_v31, %v2637_v16 }
 0x132   : > { %v745_v29 = vmul.f32 %v2987_v51, %v732_v49  ;;  %v746_v59 = vmul.f32 %v3013_v10, %v708_v33  ;;  %v3062_v39 = vadd.f32 %v787_v28, %v656_v58  ;;  %v3065_v0 = vadd.f32 %v788_v54, %v2969_v2 }
 0x133   : > { %v662_v2 = vadd.f32 %v646_v1, %v515_v12  ;;  %v348_v58 = vmul.f32 %v2746_v35, %v2616_v11  ;;  %v495_v15 = vmul.f32 %v2823_v57, %v447_v37  ;;  %v642_v28 = vmul.f32 %v2907_v62, %v2832_v61 }
 0x134   : > { %v4351_v33 = vmov 5   ;;  %v733_v19 = vsel %vm704_vm2, 0.0, %v3038_v52 }
 0x135   : > { %931 = vperm.xlu2 %2310, %v2601_v8  }
 0x136   : > { %927 = vperm.xlu1 %2309, %v2606_v9   ;;  %988 = vrot.lane.b32.xlu0 %v2664_v21, %s2455_s14 }
 0x137   : > { %v769_v6 = vpop.permute.xlu2 %768 }
 0x138   : > { %v3077_v60 = vpop.permute.xlu1 %690  ;;  %v3079_v7 = vpop.permute.xlu0 %700  ;;  %v793_v34 = vmul.f32 %v769_v6, %v745_v29  ;;  %v794_v32 = vmul.f32 %v769_v6, %v746_v59  ;;  %v437_v59 = vsel %vm410_vm1, 0.0, %v2774_v44  ;;  %v644_v44 = vmul.f32 %v2964_v45, %v2893_v27 }
 0x139   : > { %v449_v5 = vmul.f32 %v3030_v43, %v437_v59  ;;  %v3137_v27 = vperm.slane %v2858_v3, 3  ;;  %v3173_v59 = vperm.slane %v2821_v55, 3 }
 0x13a   : > { %v3082_v47 = vadd.f32 %v793_v34, %v662_v2  ;;  %v3085_v40 = vadd.f32 %v794_v32, %v2994_v41  ;;  %v511_v41 = vadd.f32 %v495_v15, %v348_v58 }
 0x13c   : > { %v658_v61 = vadd.f32 %v642_v28, %v511_v41  ;;  %v4354_v41 = vld [vmem:[#allocation27_spill] sm:$0xff] }
 0x13d   : > { %1141 = vrot.lane.b32.xlu2 %v2679_v24, %s2456_s16 }
 0x13e   : > { %1139 = vrot.lane.b32.xlu1 %v2682_v25, %s2456_s16  ;;  %1288 = vrot.lane.b32.xlu0 %v2679_v24, %s2458_s17 }
 0x13f   : > { %v3098_v54 = vpop.permute.xlu2 %776  ;;  %2311 = vset.pattern.permute.xlu1 %v4351_v33  ;;  %2312 = vset.pattern.permute.xlu2 %v4351_v33 }
 0x140   : > { %4350 = vst [vmem:[#allocation41_spill] sm:$0xff] %v3098_v54  ;;  %v3102_v35 = vpop.permute.xlu1 %696  ;;  %v761_v57 = vpop.permute.xlu0 %760  ;;  %v4368_v54 = vld [vmem:[#allocation29_spill] sm:$0xff] }
 0x141   : > { %4352 = vst [vmem:[#allocation42_spill] sm:$0xff] %v3102_v35  ;;  %v789_v62 = vmul.f32 %v761_v57, %v3006_v26  ;;  %v790_v49 = vmul.f32 %v761_v57, %v742_v36 }
 0x143   : > { %v3105_v30 = vadd.f32 %v789_v62, %v658_v61  ;;  %v3108_v29 = vadd.f32 %v790_v49, %v2915_v56  ;;  %v497_v56 = vmul.f32 %v2782_v46, %v449_v5  ;;  %v4294_v46 = vmov 6   ;;  %v4355_v61 = vld [vmem:[#allocation28_spill] sm:$0xff]  ;;  %v4356_v49 = vld [vmem:[#allocation35_spill] sm:$0xff] }
 0x145   : > { %1078 = vperm.xlu2 %2312, %v2601_v8   ;;  %v513_v12 = vadd.f32 %v497_v56, %v350_v63  ;;  %v4357_v63 = vld [vmem:[#allocation19_spill] sm:$0xff] }
 0x146   : > { %1074 = vperm.xlu1 %2311, %v2606_v9   ;;  %1135 = vrot.lane.b32.xlu0 %v2664_v21, %s2456_s16 }
 0x147   : > { %v3117_v1 = vpop.permute.xlu2 %819  ;;  %v660_v2 = vadd.f32 %v644_v44, %v513_v12  ;;  %v4358_v12 = vld [vmem:[#allocation21_spill] sm:$0xff] }
 0x148   : > { %v703_v36 = vpop.permute.xlu1 %702  ;;  %v3119_v26 = vpop.permute.xlu0 %780 }
 0x149   : > { %4353 = vst [vmem:[#allocation43_spill] sm:$0xff] %v3119_v26 }
 0x14d   : > { %986 = vrot.lane.b32.xlu2 %v2667_v22, %s2455_s14 }
 0x14e   : > { %984 = vrot.lane.b32.xlu1 %v2646_v17, %s2455_s14  ;;  %1435 = vrot.lane.b32.xlu0 %v2679_v24, %s2459_s18 }
 0x14f   : > { %v3132_v6 = vpop.permute.xlu2 %825  ;;  %2313 = vset.pattern.permute.xlu2 %v4337_v38  ;;  %2314 = vset.pattern.permute.xlu1 %v4294_v46  ;;  %v442_v38 = vsel %vm410_vm1, 0.0, %v2808_v53 }
 0x150   : > { %v765_v31 = vpop.permute.xlu1 %764  ;;  %v822_v45 = vpop.permute.xlu0 %821 }
 0x151   : > { %v791_v34 = vmul.f32 %v765_v31, %v2992_v13  ;;  %v792_v32 = vmul.f32 %v765_v31, %v3023_v48  ;;  %v852_v37 = vsel %vm851_vm3, %v3117_v1, %v822_v45  ;;  %v418_v13 = vsel %vm410_vm1, %v2808_v53, %v2770_v42 }
 0x152   : > { %v3144_v58 = vmul.f32 %v3137_v27, %v852_v37  ;;  %v459_v48 = vmul.f32 %v3030_v43, %v442_v38  ;;  %v460_v57 = vmul.f32 %v4354_v41, %v418_v13  ;;  %v565_v42 = vsel %vm557_vm0, %v4355_v61, %v4356_v49  ;;  %v4360_v38 = vld [vmem:[#allocation12_spill] sm:$0xff] }
 0x153   : > { %v3148_v15 = vadd.f32 %v791_v34, %v660_v2  ;;  %v3151_v28 = vadd.f32 %v792_v32, %v2971_v50  ;;  %v589_v50 = vsel %vm557_vm0, 0.0, %v4355_v61  ;;  %v736_v45 = vsel %vm704_vm2, 0.0, %v3079_v7  ;;  %v4359_v32 = vld [vmem:[#allocation25_spill] sm:$0xff]  ;;  %v4361_v61 = vld [vmem:[#allocation36_spill] sm:$0xff] }
 0x154   : > { %v507_v44 = vmul.f32 %v4357_v63, %v459_v48  ;;  %v606_v31 = vmul.f32 %v4358_v12, %v589_v50  ;;  %v508_v34 = vmul.f32 %v4357_v63, %v460_v57  ;;  %v607_v37 = vmul.f32 %v4359_v32, %v565_v42 }
 0x155   : > { %1286 = vrot.lane.b32.xlu2 %v2682_v25, %s2458_s17  ;;  %v360_v13 = vmul.f32 %v4360_v38, %v2679_v24  ;;  %v712_v48 = vsel %vm704_vm2, %v3079_v7, %v703_v36  ;;  %v361_v50 = vmul.f32 %v4360_v38, %v2676_v23 }
 0x156   : > { %1284 = vrot.lane.b32.xlu1 %v2661_v20, %s2458_s17  ;;  %1070 = vperm.xlu0 %2316, %v2575_v4   ;;  %v654_v49 = vmul.f32 %v4361_v61, %v606_v31  ;;  %v655_v46 = vmul.f32 %v4361_v61, %v607_v37  ;;  %v754_v42 = vmul.f32 %v3013_v10, %v712_v48  ;;  %v4363_v48 = vld [vmem:[#allocation7_spill] sm:$0xff] }
 0x157   : > { %v3165_v62 = vpop.permute.xlu2 %831  ;;  %v523_v57 = vadd.f32 %v507_v44, %v360_v13  ;;  %v524_v24 = vadd.f32 %v508_v34, %v361_v50 }
 0x158   : > { %v3170_v53 = vpop.permute.xlu1 %772  ;;  %v828_v5 = vpop.permute.xlu0 %827 }
 0x159   : > { %v878_v56 = vsel %vm851_vm3, 0.0, %v828_v5  ;;  %v670_v36 = vadd.f32 %v654_v49, %v523_v57  ;;  %v671_v38 = vadd.f32 %v655_v46, %v524_v24 }
 0x15a   : > { %v3181_v2 = vmul.f32 %v3173_v59, %v878_v56  ;;  %v753_v56 = vmul.f32 %v2987_v51, %v736_v45 }
 0x15d   : > { %923 = vperm.xlu2 %2313, %v2575_v4  }
 0x15e   : > { %1290 = vrot.lane.b32.xlu1 %v2676_v23, %s2458_s17  ;;  %978 = vrot.lane.b32.xlu0 %v2631_v14, %s2455_s14 }
 0x15f   : > { %v838_v7 = vpop.permute.xlu2 %837 }
 0x160   : > { %v785_v63 = vpop.permute.xlu1 %784  ;;  %v834_v31 = vpop.permute.xlu0 %833 }
 0x161   : > { %v801_v37 = vmul.f32 %v785_v63, %v753_v56  ;;  %v802_v61 = vmul.f32 %v785_v63, %v754_v42  ;;  %v855_v4 = vsel %vm851_vm3, %v3165_v62, %v834_v31  ;;  %v4296_v56 = vmov 7   ;;  %v4365_v63 = vld [vmem:[#allocation15_spill] sm:$0xff] }
 0x162   : > { %v3203_v44 = vmul.f32 %v3137_v27, %v855_v4  ;;  %v439_v31 = vsel %vm410_vm1, 0.0, %v4365_v63  ;;  %v4367_v4 = vld [vmem:[#allocation11_spill] sm:$0xff] }
 0x163   : > { %v3205_v45 = vadd.f32 %v801_v37, %v670_v36  ;;  %v3207_v13 = vadd.f32 %v802_v61, %v671_v38  ;;  %v4366_v38 = vld [vmem:[#allocation23_spill] sm:$0xff] }
 0x164   : > { %v586_v37 = vsel %vm557_vm0, 0.0, %v4366_v38 }
 0x165   : > { %1129 = vrot.lane.b32.xlu2 %v2649_v18, %s2456_s16 }
 0x166   : > { %1225 = vperm.xlu1 %2314, %v2601_v8   ;;  %1278 = vrot.lane.b32.xlu0 %v2646_v17, %s2458_s17 }
 0x167   : > { %v3214_v46 = vpop.permute.xlu2 %843  ;;  %2315 = vset.pattern.permute.xlu2 %v4351_v33  ;;  %v600_v33 = vmul.f32 %v4358_v12, %v586_v37 }
 0x168   : > { %4362 = vst [vmem:[#allocation28_spill] sm:$0xff] %v3214_v46  ;;  %v3217_v34 = vpop.permute.xlu1 %823  ;;  %v3219_v49 = vpop.permute.xlu0 %839 }
 0x16d   : > { %1133 = vrot.lane.b32.xlu2 %v2667_v22, %s2456_s16 }
 0x16e   : > { %1131 = vrot.lane.b32.xlu1 %v2646_v17, %s2456_s16  ;;  %1123 = vrot.lane.b32.xlu0 %v4363_v48, %s2456_s16 }
 0x16f   : > { %v3227_v50 = vpop.permute.xlu2 %849  ;;  %2317 = vset.pattern.permute.xlu1 %v4296_v56  ;;  %v415_v56 = vsel %vm410_vm1, %v4365_v63, %v4367_v4 }
 0x170   : > { %v830_v57 = vpop.permute.xlu1 %829  ;;  %v846_v24 = vpop.permute.xlu0 %845  ;;  %v454_v4 = vmul.f32 %v4354_v41, %v415_v56 }
 0x171   : > { %v854_v42 = vsel %vm851_vm3, %v828_v5, %v830_v57  ;;  %v3233_v36 = vsel %vm851_vm3, %v3214_v46, %v846_v24  ;;  %v562_v5 = vsel %vm557_vm0, %v4366_v38, %v4368_v54  ;;  %v876_v57 = vsel %vm851_vm3, 0.0, %v3117_v1 }
 0x172   : > { %4364 = vst [vmem:[#allocation35_spill] sm:$0xff] %v3233_v36  ;;  %v891_v61 = vmul.f32 %v3137_v27, %v854_v42  ;;  %v453_v24 = vmul.f32 %v3030_v43, %v439_v31  ;;  %v4369_v42 = vld [vmem:[#allocation9_spill] sm:$0xff]  ;;  %v601_v54 = vmul.f32 %v4359_v32, %v562_v5  ;;  %v4370_v31 = vld [vmem:[#allocation16_spill] sm:$0xff]  ;;  %v886_v37 = vmul.f32 %v3173_v59, %v876_v57  ;;  %v4371_v32 = vld [vmem:[#allocation30_spill] sm:$0xff] }
 0x173   : > { %v354_v63 = vmul.f32 %v4369_v42, %v2649_v18  ;;  %v355_v1 = vmul.f32 %v4369_v42, %v2646_v17  ;;  %v502_v5 = vmul.f32 %v4370_v31, %v454_v4  ;;  %v747_v36 = vmul.f32 %v2987_v51, %v733_v19 }
 0x174   : > { %v501_v38 = vmul.f32 %v4370_v31, %v453_v24  ;;  %v648_v17 = vmul.f32 %v4371_v32, %v600_v33 }
 0x175   : > { %1433 = vrot.lane.b32.xlu2 %v2682_v25, %s2459_s18  ;;  %v709_v25 = vsel %vm704_vm2, %v3038_v52, %v3077_v60  ;;  %v649_v52 = vmul.f32 %v4371_v32, %v601_v54  ;;  %v795_v32 = vmul.f32 %v3170_v53, %v747_v36 }
 0x176   : > { %1431 = vrot.lane.b32.xlu1 %v2661_v20, %s2459_s18  ;;  %1423 = vrot.lane.b32.xlu0 %v2649_v18, %s2459_s18  ;;  %v748_v60 = vmul.f32 %v3013_v10, %v709_v25  ;;  %v517_v4 = vadd.f32 %v501_v38, %v354_v63 }
 0x177   : > { %v912_v56 = vpop.permute.xlu2 %911 }
 0x178   : > { %v836_v20 = vpop.permute.xlu1 %835  ;;  %v904_v46 = vpop.permute.xlu0 %903  ;;  %v938_v26 = vmul.f32 %v912_v56, %v3181_v2  ;;  %v939_v35 = vmul.f32 %v912_v56, %v891_v61  ;;  %v664_v61 = vadd.f32 %v648_v17, %v517_v4 }
 0x179   : > { %v856_v24 = vsel %vm851_vm3, %v836_v20, %v838_v7  ;;  %v934_v42 = vmul.f32 %v904_v46, %v886_v37  ;;  %v935_v41 = vmul.f32 %v904_v46, %v3144_v58  ;;  %v880_v2 = vsel %vm851_vm3, 0.0, %v836_v20 }
 0x17a   : > { %v3278_v57 = vadd.f32 %v938_v26, %v3148_v15  ;;  %v3281_v19 = vadd.f32 %v939_v35, %v3151_v28  ;;  %v518_v58 = vadd.f32 %v502_v5, %v355_v1  ;;  %v796_v46 = vmul.f32 %v3170_v53, %v748_v60  ;;  %v4374_v26 = vld [vmem:[#allocation5_spill] sm:$0xff] }
 0x17b   : > { %v3285_v33 = vadd.f32 %v934_v42, %v3062_v39  ;;  %v3288_v7 = vadd.f32 %v935_v41, %v3065_v0  ;;  %v894_v35 = vmul.f32 %v3173_v59, %v880_v2  ;;  %v895_v28 = vmul.f32 %v3137_v27, %v856_v24 }
 0x17c   : > { %v665_v15 = vadd.f32 %v649_v52, %v518_v58  ;;  %v811_v0 = vadd.f32 %v795_v32, %v664_v61  ;;  %v877_v24 = vsel %vm851_vm3, 0.0, %v3217_v34  ;;  %v4377_v60 = vmov 6  }
 0x17d   : > { %4372 = vst [vmem:[#allocation19_spill] sm:$0xff] %v3285_v33  ;;  %1066 = vperm.xlu2 %2315, %v4374_v26   ;;  %v4305_v32 = vmov 8  }
 0x17e   : > { %4373 = vst [vmem:[#allocation21_spill] sm:$0xff] %v3288_v7  ;;  %1437 = vrot.lane.b32.xlu1 %v2676_v23, %s2459_s18  ;;  %1429 = vrot.lane.b32.xlu0 %v2664_v21, %s2459_s18  ;;  %v812_v41 = vadd.f32 %v796_v46, %v665_v15  ;;  %v4375_v23 = vmov 7   ;;  %v4376_v21 = vld [vmem:[#allocation6_spill] sm:$0xff]  ;;  %v879_v15 = vsel %vm851_vm3, 0.0, %v3165_v62  ;;  %v4416_v7 = vmov 8  }
 0x17f   : > { %v920_v39 = vpop.permute.xlu2 %919 }
 0x180   : > { %v842_v36 = vpop.permute.xlu1 %841  ;;  %v3299_v63 = vpop.permute.xlu0 %990  ;;  %v942_v53 = vmul.f32 %v920_v39, %v894_v35  ;;  %v943_v54 = vmul.f32 %v920_v39, %v895_v28  ;;  %v4380_v35 = vld [vmem:[#allocation8_spill] sm:$0xff] }
 0x181   : > { %v3303_v1 = vsel %vm851_vm3, %v3219_v49, %v842_v36 }
 0x182   : > { %v3305_v31 = vadd.f32 %v942_v53, %v811_v0  ;;  %v3307_v38 = vadd.f32 %v943_v54, %v812_v41 }
 0x185   : > { %2318 = vset.pattern.permute.xlu2 %v4375_v23 }
 0x186   : > { %1368 = vperm.xlu1 %2317, %v2606_v9   ;;  %972 = vrot.lane.b32.xlu0 %v4376_v21, %s2455_s14  ;;  %v853_v9 = vsel %vm851_vm3, %v3217_v34, %v3132_v6  ;;  %v4383_v21 = vld [vmem:[#allocation20_spill] sm:$0xff] }
 0x187   : > { %1372 = vperm.xlu2 %2318, %v2601_v8   ;;  %v995_v25 = vpop.permute.xlu2 %994  ;;  %v889_v6 = vmul.f32 %v3137_v27, %v853_v9  ;;  %v2344_v9 = vld [vmem:[%s2593_s15 + $0x60] sm:$0xff] }
 0x188   : > { %v848_v37 = vpop.permute.xlu1 %847  ;;  %v997_v56 = vpop.permute.xlu0 %996 }
 0x189   : > { %v859_v5 = vsel %vm851_vm3, %v848_v37, %v3227_v50  ;;  %v1006_v20 = vsel %vm998_vm4, %v995_v25, %v997_v56  ;;  %v883_v17 = vsel %vm851_vm3, 0.0, %v848_v37  ;;  %v888_v50 = vmul.f32 %v3173_v59, %v877_v24  ;;  %v4384_v25 = vld [vmem:[#allocation34_spill] sm:$0xff]  ;;  %v4385_v24 = vld [vmem:[#allocation13_spill] sm:$0xff] }
 0x18a   : > { %v900_v42 = vmul.f32 %v3173_v59, %v883_v17  ;;  %v901_v8 = vmul.f32 %v3137_v27, %v859_v5  ;;  %v1030_v39 = vsel %vm998_vm4, %v997_v56, 0.0 }
 0x18e   : > { %974 = vrot.lane.b32.xlu1 %v2637_v16, %s2455_s14  ;;  %1272 = vrot.lane.b32.xlu0 %v2631_v14, %s2458_s17 }
 0x18f   : > { %976 = vrot.lane.b32.xlu2 %v4363_v48, %s2455_s14  ;;  %v932_v52 = vpop.permute.xlu2 %931  ;;  %2319 = vset.pattern.permute.xlu1 %v4377_v60 }
 0x190   : > { %v908_v34 = vpop.permute.xlu1 %907  ;;  %v3334_v4 = vpop.permute.xlu0 %1137  ;;  %v948_v2 = vmul.f32 %v932_v52, %v900_v42  ;;  %v949_v58 = vmul.f32 %v932_v52, %v901_v8  ;;  %2320 = vset.pattern.permute.xlu2 %v4305_v32  ;;  %v358_v42 = vmul.f32 %v2344_v9, %v4385_v24  ;;  %v4386_v8 = vld [vmem:[#allocation27_spill] sm:$0xff]  ;;  %v4388_v52 = vld [vmem:[#allocation42_spill] sm:$0xff]  ;;  %v4393_v9 = vld [vmem:[#allocation28_spill] sm:$0xff] }
 0x191   : > { %v936_v16 = vmul.f32 %v908_v34, %v888_v50  ;;  %v937_v14 = vmul.f32 %v908_v34, %v889_v6  ;;  %v4387_v6 = vld [vmem:[#allocation25_spill] sm:$0xff]  ;;  %v735_v34 = vsel %vm704_vm2, 0.0, %v4388_v52 }
 0x192   : > { %v964_v46 = vadd.f32 %v948_v2, %v3205_v45  ;;  %v965_v48 = vadd.f32 %v949_v58, %v3207_v13  ;;  %v892_v45 = vmul.f32 %v3173_v59, %v879_v15  ;;  %v3402_v2 = vld [vmem:[%s2593_s15 + $0x58] sm:$0xff] }
 0x193   : > { %v3340_v61 = vadd.f32 %v936_v16, %v3105_v30  ;;  %v3343_v26 = vadd.f32 %v937_v14, %v3108_v29  ;;  %v3355_v30 = vperm.slane %v2858_v3, 5  ;;  %v3358_v29 = vperm.slane %v2821_v55, 5  ;;  %v4381_v3 = vld [vmem:[#allocation14_spill] sm:$0xff]  ;;  %v4382_v55 = vld [vmem:[#allocation32_spill] sm:$0xff]  ;;  %v4390_v14 = vld [vmem:[#allocation39_spill] sm:$0xff] }
 0x194   : > { %v441_v41 = vsel %vm410_vm1, 0.0, %v4381_v3  ;;  %v588_v36 = vsel %vm557_vm0, 0.0, %v4382_v55  ;;  %v564_v37 = vsel %vm557_vm0, %v4382_v55, %v4384_v25  ;;  %v4389_v58 = vld [vmem:[#allocation24_spill] sm:$0xff]  ;;  %v711_v15 = vsel %vm704_vm2, %v4388_v52, %v4390_v14  ;;  %v4394_v52 = vld [vmem:[#allocation35_spill] sm:$0xff] }
 0x195   : > { %4378 = vst [vmem:[#allocation12_spill] sm:$0xff] %v3340_v61  ;;  %v1048_v56 = vmul.f32 %v3355_v30, %v1030_v39  ;;  %v1047_v5 = vmul.f32 %v3358_v29, %v1006_v20  ;;  %v457_v17 = vmul.f32 %v3030_v43, %v441_v41  ;;  %v605_v20 = vmul.f32 %v4387_v6, %v564_v37  ;;  %v2346_v39 = vld [vmem:[%s2593_s15 + $0x68] sm:$0xff]  ;;  %v4391_v41 = vld [vmem:[#allocation33_spill] sm:$0xff] }
 0x196   : > { %4379 = vst [vmem:[#allocation36_spill] sm:$0xff] %v3343_v26  ;;  %980 = vrot.lane.b32.xlu1 %v4380_v35, %s2455_s14  ;;  %1117 = vrot.lane.b32.xlu0 %v2616_v11, %s2456_s16  ;;  %v752_v37 = vmul.f32 %v3013_v10, %v711_v15 }
 0x197   : > { %1276 = vrot.lane.b32.xlu2 %v2649_v18, %s2458_s17  ;;  %v1142_v13 = vpop.permute.xlu2 %1141  ;;  %v505_v16 = vmul.f32 %v4389_v58, %v457_v17  ;;  %v653_v25 = vmul.f32 %v4391_v41, %v605_v20 }
 0x198   : > { %v916_v28 = vpop.permute.xlu1 %915  ;;  %v3360_v62 = vpop.permute.xlu0 %1143 }
 0x199   : > { %v940_v11 = vmul.f32 %v916_v28, %v892_v45  ;;  %v941_v18 = vmul.f32 %v916_v28, %v3203_v44  ;;  %v3366_v0 = vsel %vm1145_vm5, %v1142_v13, %v3360_v62  ;;  %v417_v44 = vsel %vm410_vm1, %v4381_v3, %v4383_v21 }
 0x19a   : > { %v458_v50 = vmul.f32 %v4386_v8, %v417_v44 }
 0x19b   : > { %v3373_v53 = vadd.f32 %v940_v11, %v3082_v47  ;;  %v3376_v54 = vadd.f32 %v941_v18, %v3085_v40  ;;  %v604_v47 = vmul.f32 %v4358_v12, %v588_v36  ;;  %v3391_v40 = vld [vmem:[%s2593_s15 + $0x28] sm:$0xff]  ;;  %v359_v11 = vmul.f32 %v2346_v39, %v4385_v24 }
 0x19c   : > { %v506_v18 = vmul.f32 %v4389_v58, %v458_v50  ;;  %v751_v36 = vmul.f32 %v2987_v51, %v735_v34  ;;  %v882_v24 = vsel %vm851_vm3, 0.0, %v4393_v9  ;;  %v899_v34 = vmul.f32 %v3137_v27, %v4394_v52  ;;  %v4400_v9 = vld [vmem:[#allocation38_spill] sm:$0xff] }
 0x19d   : > { %v652_v55 = vmul.f32 %v4391_v41, %v604_v47  ;;  %v898_v20 = vmul.f32 %v3173_v59, %v882_v24  ;;  %v4396_v41 = vld [vmem:[#allocation18_spill] sm:$0xff] }
 0x19e   : > { %1280 = vrot.lane.b32.xlu1 %v2667_v22, %s2458_s17  ;;  %1417 = vrot.lane.b32.xlu0 %v3391_v40, %s2459_s18  ;;  %v522_v50 = vadd.f32 %v506_v18, %v359_v11  ;;  %v4395_v18 = vld [vmem:[#allocation17_spill] sm:$0xff] }
 0x19f   : > { %1282 = vrot.lane.b32.xlu2 %v3402_v2, %s2458_s17  ;;  %v1079_v22 = vpop.permute.xlu2 %1078 }
 0x1a0   : > { %v3410_v35 = vpop.permute.xlu1 %992  ;;  %v3412_v45 = vpop.permute.xlu0 %982  ;;  %v1095_v13 = vmul.f32 %v1079_v22, %v1047_v5  ;;  %v1096_v28 = vmul.f32 %v1079_v22, %v1048_v56  ;;  %v521_v56 = vadd.f32 %v505_v16, %v358_v42  ;;  %v4392_v5 = vld [vmem:[#allocation43_spill] sm:$0xff]  ;;  %v669_v42 = vadd.f32 %v653_v25, %v522_v50 }
 0x1a1   : > { %v1005_v3 = vsel %vm998_vm4, %v3299_v63, %v3410_v35  ;;  %v799_v17 = vmul.f32 %v4392_v5, %v751_v36  ;;  %v800_v63 = vmul.f32 %v4392_v5, %v752_v37  ;;  %v2349_v22 = vld [vmem:[%s4250_s1 + $0x30] sm:$0xff]  ;;  %v4397_v37 = vld [vmem:[#allocation26_spill] sm:$0xff] }
 0x1a2   : > { %v3422_v21 = vadd.f32 %v1095_v13, %v964_v46  ;;  %v3424_v44 = vadd.f32 %v1096_v28, %v965_v48  ;;  %v668_v47 = vadd.f32 %v652_v55, %v521_v56  ;;  %v3435_v46 = vld [vmem:[%s4250_s1 + $0x28] sm:$0xff]  ;;  %v3441_v48 = vld [vmem:[%s4250_s1] sm:$0xff]  ;;  %v416_v55 = vsel %vm410_vm1, %v4396_v41, %v4395_v18  ;;  %v4398_v56 = vld [vmem:[#allocation31_spill] sm:$0xff] }
 0x1a3   : > { %v816_v13 = vadd.f32 %v800_v63, %v669_v42  ;;  %v563_v5 = vsel %vm557_vm0, %v4398_v56, %v4397_v37  ;;  %v456_v50 = vmul.f32 %v4386_v8, %v416_v55  ;;  %v2350_v63 = vld [vmem:[%s4250_s1 + $0x38] sm:$0xff]  ;;  %v4401_v42 = vld [vmem:[#allocation22_spill] sm:$0xff]  ;;  %v4405_v55 = vld [vmem:[#allocation41_spill] sm:$0xff] }
 0x1a4   : > { %v815_v16 = vadd.f32 %v799_v17, %v668_v47  ;;  %v4399_v17 = vld [vmem:[#allocation40_spill] sm:$0xff]  ;;  %v603_v52 = vmul.f32 %v4387_v6, %v563_v5  ;;  %v4402_v6 = vmov 5  }
 0x1a5   : > { %v710_v24 = vsel %vm704_vm2, %v4400_v9, %v4399_v17 }
 0x1a6   : > { %1217 = vperm.xlu1 %2319, %v3435_v46   ;;  %1050 = vperm.xlu0 %2316, %v3441_v48  }
 0x1a7   : > { %1515 = vperm.xlu2 %2320, %v2349_v22   ;;  %v987_v58 = vpop.permute.xlu2 %986 }
 0x1a8   : > { %v928_v14 = vpop.permute.xlu1 %927  ;;  %v3450_v15 = vpop.permute.xlu0 %988 }
 0x1a9   : > { %v946_v28 = vmul.f32 %v928_v14, %v898_v20  ;;  %v947_v39 = vmul.f32 %v928_v14, %v899_v34  ;;  %v3454_v11 = vsel %vm998_vm4, %v987_v58, %v3450_v15  ;;  %v504_v20 = vmul.f32 %v4401_v42, %v456_v50  ;;  %v3477_v58 = vld [vmem:[%s2593_s15 + $0x20] sm:$0xff] }
 0x1aa   : > { %v750_v34 = vmul.f32 %v3013_v10, %v710_v24  ;;  %v4403_v10 = vld [vmem:[#allocation10_spill] sm:$0xff]  ;;  %v1045_v24 = vmul.f32 %v3358_v29, %v1005_v3  ;;  %v3518_v3 = vld [vmem:[%s2593_s15 + $0x38] sm:$0xff] }
 0x1ab   : > { %v962_v36 = vadd.f32 %v946_v28, %v815_v16  ;;  %v963_v25 = vadd.f32 %v947_v39, %v816_v13  ;;  %v357_v13 = vmul.f32 %v3402_v2, %v4403_v10  ;;  %v4404_v28 = vld [vmem:[#allocation37_spill] sm:$0xff]  ;;  %v3505_v2 = vld [vmem:[%s2593_s15 + $0x30] sm:$0xff] }
 0x1ac   : > { %v651_v39 = vmul.f32 %v4404_v28, %v603_v52  ;;  %v798_v37 = vmul.f32 %v4405_v55, %v750_v34 }
 0x1ad   : > { %v520_v18 = vadd.f32 %v504_v20, %v357_v13 }
 0x1ae   : > { %2321 = vset.pattern.permute.xlu1 %v4305_v32  ;;  %2328 = vset.pattern.permute.xlu0 %v4377_v60 }
 0x1af   : > { %1519 = vperm.xlu1 %2321, %v2350_v63   ;;  %1221 = vperm.xlu0 %2328, %v2349_v22   ;;  %v3471_v47 = vpop.permute.xlu2 %1286  ;;  %v881_v22 = vsel %vm851_vm3, 0.0, %v3219_v49  ;;  %v1029_v49 = vsel %vm998_vm4, %v3410_v35, 0.0  ;;  %v667_v17 = vadd.f32 %v651_v39, %v520_v18 }
 0x1b0   : > { %1121 = vrot.lane.b32.xlu2 %v3477_v58, %s2456_s16  ;;  %v3481_v8 = vpop.permute.xlu1 %1139  ;;  %v3483_v16 = vpop.permute.xlu0 %1288  ;;  %v896_v5 = vmul.f32 %v3173_v59, %v881_v22  ;;  %v1046_v50 = vmul.f32 %v3355_v30, %v1029_v49  ;;  %v3512_v59 = vld [vmem:[%s4250_s1 + $0x20] sm:$0xff]  ;;  %v587_v49 = vsel %vm557_vm0, 0.0, %v4398_v56  ;;  %v1323_v33 = vsel %vm1292_vm6, %v3471_v47, 0.0 }
 0x1b1   : > { %v3490_v14 = vsel %vm1145_vm5, %v3334_v4, %v3481_v8  ;;  %2323 = vset.pattern.permute.xlu2 %v4402_v6  ;;  %v897_v4 = vmul.f32 %v3137_v27, %v3303_v1  ;;  %v440_v27 = vsel %vm410_vm1, 0.0, %v4396_v41  ;;  %v814_v1 = vadd.f32 %v798_v37, %v667_v17 }
 0x1b2   : > { %v455_v41 = vmul.f32 %v3030_v43, %v440_v27  ;;  %v734_v17 = vsel %vm704_vm2, 0.0, %v4400_v9  ;;  %v3542_v43 = vld [vmem:[%s4250_s1 + $0x18] sm:$0xff] }
 0x1b7   : > { %1125 = vrot.lane.b32.xlu1 %v3505_v2, %s2456_s16  ;;  %1213 = vperm.xlu0 %2328, %v3512_v59   ;;  %v924_v35 = vpop.permute.xlu2 %923 }
 0x1b8   : > { %1127 = vrot.lane.b32.xlu2 %v3518_v3, %s2456_s16  ;;  %v1075_v63 = vpop.permute.xlu1 %1074  ;;  %v3522_v20 = vpop.permute.xlu0 %1135  ;;  %v944_v52 = vmul.f32 %v924_v35, %v896_v5  ;;  %v945_v34 = vmul.f32 %v924_v35, %v897_v4  ;;  %2322 = vset.pattern.permute.xlu1 %v4402_v6  ;;  %v503_v5 = vmul.f32 %v4401_v42, %v455_v41  ;;  %v1028_v35 = vsel %vm998_vm4, %v3450_v15, 0.0 }
 0x1b9   : > { %v1093_v22 = vmul.f32 %v1075_v63, %v1045_v24  ;;  %v1094_v13 = vmul.f32 %v1075_v63, %v1046_v50  ;;  %v602_v4 = vmul.f32 %v4358_v12, %v587_v49  ;;  %v749_v24 = vmul.f32 %v2987_v51, %v734_v17  ;;  %v2355_v50 = vld [vmem:[%s2593_s15 + $0x48] sm:$0xff] }
 0x1ba   : > { %v961_v39 = vadd.f32 %v945_v34, %v814_v1  ;;  %v1044_v34 = vmul.f32 %v3355_v30, %v1028_v35  ;;  %v2361_v35 = vld [vmem:[%s4251_s2 + $0x8] sm:$0xff] }
 0x1bb   : > { %v3526_v18 = vadd.f32 %v1093_v22, %v962_v36  ;;  %v3528_v37 = vadd.f32 %v1094_v13, %v963_v25  ;;  %v2357_v25 = vld [vmem:[%s2593_s15 + $0x50] sm:$0xff]  ;;  %v650_v9 = vmul.f32 %v4404_v28, %v602_v4  ;;  %v797_v1 = vmul.f32 %v4405_v55, %v749_v24 }
 0x1bc   : > { %v356_v51 = vmul.f32 %v2357_v25, %v4403_v10  ;;  %v1043_v22 = vmul.f32 %v3358_v29, %v3454_v11  ;;  %v3564_v10 = vld [vmem:[%s4250_s1 + $0x10] sm:$0xff] }
 0x1be   : > { %v519_v27 = vadd.f32 %v503_v5, %v356_v51 }
 0x1bf   : > { %1425 = vrot.lane.b32.xlu1 %v2355_v50, %s2459_s18  ;;  %1209 = vperm.xlu0 %2328, %v3542_v43   ;;  %v3545_v36 = vpop.permute.xlu2 %1129 }
 0x1c0   : > { %1427 = vrot.lane.b32.xlu2 %v2357_v25, %s2459_s18  ;;  %v985_v56 = vpop.permute.xlu1 %984  ;;  %v3549_v12 = vpop.permute.xlu0 %1435  ;;  %v666_v63 = vadd.f32 %v650_v9, %v519_v27  ;;  %v3590_v25 = vld [vmem:[%s2593_s15] sm:$0xff]  ;;  %v1177_v9 = vsel %vm1145_vm5, %v3360_v62, 0.0  ;;  %v3605_v27 = vperm.slane %v2361_v35, 6 }
 0x1c1   : > { %v1003_v42 = vsel %vm998_vm4, %v3412_v45, %v985_v56  ;;  %v3568_v45 = vld [vmem:[%s2593_s15 + $0x8] sm:$0xff] }
 0x1c2   : > { %v813_v13 = vadd.f32 %v797_v1, %v666_v63  ;;  %v1027_v1 = vsel %vm998_vm4, %v985_v56, 0.0  ;;  %v1195_v63 = vmul.f32 %v3605_v27, %v1177_v9 }
 0x1c3   : > { %v1042_v62 = vmul.f32 %v3355_v30, %v1027_v1 }
 0x1c4   : > { %v960_v41 = vadd.f32 %v944_v52, %v813_v13 }
 0x1c7   : > { %1058 = vperm.xlu1 %2322, %v3564_v10   ;;  %1262 = vrot.lane.b32.xlu0 %v3568_v45, %s2458_s17  ;;  %v1134_v15 = vpop.permute.xlu2 %1133 }
 0x1c8   : > { %1062 = vperm.xlu2 %2323, %v3542_v43   ;;  %v1285_v28 = vpop.permute.xlu1 %1284  ;;  %v1071_v11 = vpop.permute.xlu0 %1070  ;;  %v3575_v55 = vsel %vm1145_vm5, %v1134_v15, %v3522_v20 }
 0x1c9   : > { %v3579_v49 = vsel %vm1292_vm6, %v1285_v28, %v3471_v47  ;;  %v1091_v17 = vmul.f32 %v1071_v11, %v1043_v22  ;;  %v1092_v5 = vmul.f32 %v1071_v11, %v1044_v34  ;;  %v2362_v34 = vld [vmem:[%s4251_s2] sm:$0xff]  ;;  %v1041_v22 = vmul.f32 %v3358_v29, %v1003_v42  ;;  %v3620_v28 = vld [vmem:[%s2593_s15 + $0x10] sm:$0xff] }
 0x1cb   : > { %v3581_v4 = vadd.f32 %v1091_v17, %v960_v41  ;;  %v3583_v24 = vadd.f32 %v1092_v5, %v961_v39 }
 0x1cf   : > { %2324 = vset.pattern.permute.xlu1 %v4375_v23  ;;  %1197 = vperm.xlu0 %2328, %v3441_v48   ;;  %v3587_v50 = vpop.permute.xlu2 %1433 }
 0x1d0   : > { %966 = vrot.lane.b32.xlu2 %v3590_v25, %s2455_s14  ;;  %1364 = vperm.xlu1 %2324, %v3435_v46   ;;  %v1291_v52 = vpop.permute.xlu1 %1290  ;;  %v3595_v51 = vpop.permute.xlu0 %978 }
 0x1d1   : > { %v1300_v39 = vsel %vm1292_vm6, %v3483_v16, %v1291_v52  ;;  %2325 = vset.pattern.permute.xlu2 %v4377_v60  ;;  %v3612_v16 = vperm.slane %v2362_v34, 6 }
 0x1d3   : > { %v1194_v13 = vmul.f32 %v3612_v16, %v3366_v0  ;;  %v1192_v47 = vmul.f32 %v3612_v16, %v3490_v14 }
 0x1d7   : > { %2332 = vset.pattern.permute.xlu0 %v4375_v23  ;;  %v1067_v15 = vpop.permute.xlu2 %1066 }
 0x1d8   : > { %970 = vrot.lane.b32.xlu2 %v3620_v28, %s2455_s14  ;;  %968 = vrot.lane.b32.xlu1 %v3568_v45, %s2455_s14  ;;  %v1226_v56 = vpop.permute.xlu1 %1225  ;;  %v1089_v11 = vmul.f32 %v1067_v15, %v1041_v22  ;;  %v1090_v41 = vmul.f32 %v1067_v15, %v1042_v62  ;;  %v3626_v42 = vpop.permute.xlu0 %1278  ;;  %v3638_v22 = vperm.slane %v2361_v35, 7  ;;  %v3640_v62 = vperm.slane %v2362_v34, 7  ;;  %s2083_s14 = scalar_lea.hbm %s4256_s7, %s2238_s13 }
 0x1d9   : > { %4406 = vst [vmem:[#allocation7_spill] sm:$0xff] %v3626_v42  ;;  %v1242_v17 = vmul.f32 %v1226_v56, %v1194_v13  ;;  %v1243_v5 = vmul.f32 %v1226_v56, %v1195_v63  ;;  %1360 = vperm.xlu0 %2332, %v3512_v59   ;;  %2326 = vset.pattern.permute.xlu1 %v4305_v32  ;;  %v1324_v63 = vsel %vm1292_vm6, %v1291_v52, 0.0  ;;  %s2086_s28 = sshll.u32 %s2083_s14, 4  ;;  %s2087_s28 = int_to_ptr.hbm [resolvable:$true] %s2086_s28 }
 0x1da   : > { %v3631_v0 = vadd.f32 %v1089_v11, %v3305_v31  ;;  %v3634_v9 = vadd.f32 %v1090_v41, %v3307_v38  ;;  %v1341_v13 = vmul.f32 %v3640_v62, %v1300_v39  ;;  %s2396_s23 = sshra.s32 %s2087_s28, 4  ;;  %s2397_s23 = int_to_ptr.hbm [resolvable:$true] %s2396_s23 }
 0x1db   : > { %v1258_v1 = vadd.f32 %v1242_v17, %v3422_v21  ;;  %v1259_v26 = vadd.f32 %v1243_v5, %v3424_v44  ;;  %v1342_v21 = vmul.f32 %v3638_v22, %v1324_v63  ;;  %v4409_v17 = vmov 0   ;;  %s2398_s29 = scalar_lea.hbm %s2397_s23, 128  ;;  %p2403_p0 = scmp.lt.s32.totalorder %s2397_s23, %s4256_s7 }
 0x1dc   : > { %p2399_p11 = scmp.ne.s32.totalorder %s2397_s23, %s2398_s29 }
 0x1de   : > { %p2400_p12 = pnand %p2399_p11, %p2542_p5 }
 0x1e0   : > { %1270 = vrot.lane.b32.xlu2 %v3391_v40, %s2458_s17  ;;  %1268 = vrot.lane.b32.xlu1 %v3477_v58, %s2458_s17  ;;  %v3648_v31 = vpop.permute.xlu1 %1131  ;;  %v3650_v38 = vpop.permute.xlu0 %1123  ;;  %p2401_p13 = pneg %p2400_p12 }
 0x1e1   : > { %v3656_v44 = vsel %vm1145_vm5, %v3545_v36, %v3648_v31  ;;  %1409 = vrot.lane.b32.xlu0 %v3568_v45, %s2459_s18  ;;  %v1373_v52 = vpop.permute.xlu2 %1372 }
 0x1e2   : > { %v1389_v39 = vmul.f32 %v1373_v52, %v1341_v13  ;;  %v1390_v40 = vmul.f32 %v1373_v52, %v1342_v21 }
 0x1e4   : > { %v3660_v35 = vadd.f32 %v1389_v39, %v1258_v1  ;;  %v3662_v34 = vadd.f32 %v1390_v40, %v1259_v26 }
 0x1e8   : > { %1205 = vperm.xlu2 %2325, %v3564_v10   ;;  %1274 = vrot.lane.b32.xlu1 %v3518_v3, %s2458_s17  ;;  %v3667_v15 = vpop.permute.xlu1 %1431  ;;  %v3669_v56 = vpop.permute.xlu0 %1423 }
 0x1e9   : > { %4407 = vst [vmem:[#allocation15_spill] sm:$0xff] %v3669_v56  ;;  %1344 = vperm.xlu0 %2332, %v3441_v48   ;;  %v3672_v36 = vpop.permute.xlu2 %976 }
 0x1f0   : > { %2327 = vset.pattern.permute.xlu2 %v4305_v32  ;;  %1507 = vperm.xlu1 %2326, %v3512_v59   ;;  %v1438_v26 = vpop.permute.xlu1 %1437  ;;  %v3676_v11 = vpop.permute.xlu0 %1429 }
 0x1f1   : > { %4408 = vst [vmem:[#allocation23_spill] sm:$0xff] %v3676_v11  ;;  %1511 = vperm.xlu2 %2327, %v3435_v46   ;;  %v1277_v41 = vpop.permute.xlu2 %1276  ;;  %2339 = vset.pattern.permute.xlu0 %v4409_v17  ;;  %v3697_v46 = vld [vmem:[%s2593_s15 + $0x18] sm:$0xff] }
 0x1f2   : > { %v3682_v5 = vsel %vm1292_vm6, %v1277_v41, %v3626_v42 }
 0x1f3   : > { %4410 = vst [vmem:[#allocation11_spill] sm:$0xff] %v3682_v5 }
 0x1f8   : > { %1113 = vrot.lane.b32.xlu1 %v3590_v25, %s2456_s16  ;;  %v3686_v1 = vpop.permute.xlu1 %1368  ;;  %v3688_v63 = vpop.permute.xlu0 %972 }
 0x1f9   : > { %1115 = vrot.lane.b32.xlu2 %v3568_v45, %s2456_s16  ;;  %v3692_v59 = vpop.permute.xlu2 %1282  ;;  %2329 = vset.pattern.permute.xlu1 %v4402_v6 }
 0x1fa   : > { %2330 = vset.pattern.permute.xlu2 %v4375_v23 }
 0x200   : > { %1119 = vrot.lane.b32.xlu1 %v3697_v46, %s2456_s16  ;;  %v975_v13 = vpop.permute.xlu1 %974  ;;  %v3701_v21 = vpop.permute.xlu0 %1272 }
 0x201   : > { %4411 = vst [vmem:[#allocation29_spill] sm:$0xff] %v3701_v21  ;;  %v3705_v52 = vsel %vm998_vm4, %v975_v13, %v3672_v36  ;;  %1415 = vrot.lane.b32.xlu2 %v3477_v58, %s2459_s18  ;;  %v3709_v45 = vpop.permute.xlu2 %1515  ;;  %v3726_v58 = vld [vmem:[%s4250_s1 + $0x8] sm:$0xff]  ;;  %v1190_v21 = vmul.f32 %v3612_v16, %v3575_v55 }
 0x208   : > { %1419 = vrot.lane.b32.xlu1 %v3505_v2, %s2459_s18  ;;  %v981_v6 = vpop.permute.xlu1 %980  ;;  %v3713_v39 = vpop.permute.xlu0 %1117 }
 0x209   : > { %4412 = vst [vmem:[#allocation9_spill] sm:$0xff] %v3713_v39  ;;  %v1002_v40 = vsel %vm998_vm4, %v3595_v51, %v981_v6  ;;  %1421 = vrot.lane.b32.xlu2 %v3518_v3, %s2459_s18  ;;  %v1175_v3 = vsel %vm1145_vm5, %v3522_v20, 0.0 }
 0x20a   : > { %v1122_v41 = vpop.permute.xlu2 %1121  ;;  %v1191_v39 = vmul.f32 %v3605_v27, %v1175_v3  ;;  %v1039_v5 = vmul.f32 %v3358_v29, %v1002_v40 }
 0x20b   : > { %v3721_v13 = vsel %vm1145_vm5, %v1122_v41, %v3650_v38 }
 0x210   : > { %1054 = vperm.xlu1 %2329, %v3726_v58   ;;  %v1281_v2 = vpop.permute.xlu1 %1280  ;;  %v3729_v32 = vpop.permute.xlu0 %1417 }
 0x211   : > { %4413 = vst [vmem:[#allocation16_spill] sm:$0xff] %v3729_v32  ;;  %v3733_v51 = vsel %vm1292_vm6, %v1281_v2, %v3692_v59  ;;  %1352 = vperm.xlu2 %2330, %v3564_v10  }
 0x212   : > { %v3738_v41 = vpop.permute.xlu2 %1127 }
 0x218   : > { %2331 = vset.pattern.permute.xlu1 %v4375_v23  ;;  %v1218_v61 = vpop.permute.xlu1 %1217  ;;  %v3744_v32 = vpop.permute.xlu0 %1050 }
 0x219   : > { %4414 = vst [vmem:[#allocation30_spill] sm:$0xff] %v3744_v32  ;;  %v1238_v56 = vmul.f32 %v1218_v61, %v1190_v21  ;;  %v1239_v2 = vmul.f32 %v1218_v61, %v1191_v39  ;;  %1260 = vrot.lane.b32.xlu2 %v3590_v25, %s2458_s17  ;;  %1356 = vperm.xlu1 %2331, %v3542_v43   ;;  %v1176_v61 = vsel %vm1145_vm5, %v3481_v8, 0.0  ;;  %v1470_v39 = vsel %vm1439_vm7, %v3587_v50, 0.0  ;;  %v3778_v8 = vld [vmem:[%s4251_s2 + $0x18] ss:$0 sm:$0xff] }
 0x21a   : > { %v3749_v20 = vpop.permute.xlu2 %1427  ;;  %2334 = vset.pattern.permute.xlu2 %v4416_v7  ;;  %v1447_v21 = vsel %vm1439_vm7, %v3549_v12, %v1438_v26  ;;  %v1446_v12 = vsel %vm1439_vm7, %v3667_v15, %v3587_v50  ;;  %v1339_v32 = vmul.f32 %v3640_v62, %v3579_v49 }
 0x21b   : > { %4415 = vst [vmem:[#allocation5_spill] sm:$0xff] %v3749_v20  ;;  %v3753_v3 = vadd.f32 %v1238_v56, %v3581_v4  ;;  %v3756_v55 = vadd.f32 %v1239_v2, %v3583_v24  ;;  %v3769_v4 = vld [vmem:[%s4251_s2 + $0x10] ss:$0 sm:$0xff]  ;;  %v1026_v24 = vsel %vm998_vm4, %v981_v6, 0.0  ;;  %v1340_v56 = vmul.f32 %v3638_v22, %v1323_v33 }
 0x21c   : > { %v1193_v2 = vmul.f32 %v3605_v27, %v1176_v61  ;;  %v1471_v6 = vsel %vm1439_vm7, %v1438_v26, 0.0  ;;  %v1488_v14 = vmul.f32 %v3769_v4, %v1447_v21  ;;  %v1487_v33 = vmul.f32 %v3778_v8, %v1470_v39 }
 0x21d   : > { %4417 = vst [vmem:[#allocation6_spill] sm:$0xff] %v3753_v3  ;;  %v1040_v17 = vmul.f32 %v3355_v30, %v1026_v24  ;;  %v1486_v49 = vmul.f32 %v3769_v4, %v1446_v12  ;;  %v1489_v40 = vmul.f32 %v3778_v8, %v1471_v6  ;;  %v1387_v39 = vmul.f32 %v3686_v1, %v1339_v32 }
 0x21e   : > { %4418 = vst [vmem:[#allocation8_spill] sm:$0xff] %v3756_v55  ;;  %v1388_v11 = vmul.f32 %v3686_v1, %v1340_v56 }
 0x21f   : > { %v1534_v32 = vmul.f32 %v3709_v45, %v1486_v49 }
 0x221   : > { %1266 = vrot.lane.b32.xlu2 %v3697_v46, %s2458_s17  ;;  %1264 = vrot.lane.b32.xlu1 %v3620_v28, %s2458_s17  ;;  %v1520_v50 = vpop.permute.xlu1 %1519  ;;  %v1222_v15 = vpop.permute.xlu0 %1221  ;;  %s269_s17 = sand.u32 1, %s2436_s25  }
 0x222   : > { %v1536_v61 = vmul.f32 %v1520_v50, %v1488_v14  ;;  %v1240_v26 = vmul.f32 %v1222_v15, %v1192_v47  ;;  %v1241_v20 = vmul.f32 %v1222_v15, %v1193_v2  ;;  %v1063_v21 = vpop.permute.xlu2 %1062  ;;  %2333 = vset.pattern.permute.xlu1 %v4377_v60  ;;  %v1174_v47 = vsel %vm1145_vm5, %v3648_v31, 0.0  ;;  %s2072_s22 = scalar_lea.sflag [#allocation3], %s269_s17 }
 0x223   : > { %v1087_v24 = vmul.f32 %v1063_v21, %v1039_v5  ;;  %v1088_v42 = vmul.f32 %v1063_v21, %v1040_v17  ;;  %v1537_v2 = vmul.f32 %v1520_v50, %v1489_v40  ;;  %v1535_v17 = vmul.f32 %v3709_v45, %v1487_v33 }
 0x224   : > { %v1256_v55 = vadd.f32 %v1240_v26, %v3526_v18  ;;  %v1257_v3 = vadd.f32 %v1241_v20, %v3528_v37  ;;  %v1552_v12 = vadd.f32 %v1536_v61, %v3660_v35  ;;  %v1188_v18 = vmul.f32 %v3612_v16, %v3656_v44 }
 0x225   : > { %v1103_v60 = vadd.f32 %v1087_v24, %v3373_v53  ;;  %v1104_v6 = vadd.f32 %v1088_v42, %v3376_v54  ;;  %v1189_v37 = vmul.f32 %v3605_v27, %v1174_v47  ;;  %v1553_v54 = vadd.f32 %v1537_v2, %v3662_v34 }
 0x226   : > { %v1403_v5 = vadd.f32 %v1387_v39, %v1256_v55  ;;  %v1404_v1 = vadd.f32 %v1388_v11, %v1257_v3  ;;  %v1173_v55 = vsel %vm1145_vm5, %v3738_v41, 0.0  ;;  %v1037_v40 = vmul.f32 %v3358_v29, %v3705_v52 }
 0x227   : > { %v1187_v34 = vmul.f32 %v3605_v27, %v1173_v55  ;;  %v4425_v55 = vld [vmem:[#allocation11_spill] sm:$0xff] }
 0x228   : > { %v1550_v35 = vadd.f32 %v1534_v32, %v1403_v5  ;;  %v1551_v20 = vadd.f32 %v1535_v17, %v1404_v1  ;;  %v1184_v32 = vmul.f32 %v3612_v16, %v3721_v13  ;;  %v4419_v13 = vld [vmem:[#allocation6_spill] sm:$0xff] }
 0x229   : > { %1499 = vperm.xlu2 %2334, %v3564_v10   ;;  %1201 = vperm.xlu1 %2333, %v3726_v58   ;;  %v1126_v53 = vpop.permute.xlu1 %1125  ;;  %v1214_v31 = vpop.permute.xlu0 %1213 }
 0x22a   : > { %v1149_v42 = vsel %vm1145_vm5, %v1126_v53, %v3738_v41  ;;  %v1236_v45 = vmul.f32 %v1214_v31, %v1188_v18  ;;  %v1237_v11 = vmul.f32 %v1214_v31, %v1189_v37  ;;  %v3817_v3 = vpop.permute.xlu2 %966  ;;  %v1576_v44 = vpack.c.bf16 %v1552_v12, %v1550_v35  ;;  %v4420_v35 = vld [vmem:[#allocation8_spill] sm:$0xff]  ;;  %v4422_v53 = vld [vmem:[#allocation7_spill] sm:$0xff] }
 0x22b   : > { %v1577_v56 = vpack.c.bf16 %v1553_v54, %v1551_v20  ;;  %v1186_v33 = vmul.f32 %v3612_v16, %v1149_v42  ;;  %v4421_v20 = vld [vmem:[#allocation23_spill] sm:$0xff]  ;;  %v1321_v31 = vsel %vm1292_vm6, %v4422_v53, 0.0  ;;  %v4423_v54 = vld [vmem:[#allocation5_spill] sm:$0xff] }
 0x22c   : > { %v3822_v10 = vadd.f32 %v1236_v45, %v3631_v0  ;;  %v3825_v14 = vadd.f32 %v1237_v11, %v3634_v9  ;;  %1743 = vmatpush.bf16.msra.mxu0 %v1576_v44  ;;  %v1445_v42 = vsel %vm1439_vm7, %v4423_v54, %v4421_v20  ;;  %v4424_v11 = vmov 0   ;;  %v4429_v53 = vld [vmem:[#allocation15_spill] sm:$0xff] }
 0x22d   : > { %1792 = vmatpush.bf16.msra.mxu1 %v1577_v56  ;;  %v1336_v44 = vmul.f32 %v3638_v22, %v1321_v31  ;;  %v1335_v56 = vmul.f32 %v3640_v62, %v4425_v55 }
 0x231   : > { %1407 = vrot.lane.b32.xlu2 %v3590_v25, %s2459_s18  ;;  %2335 = vset.pattern.permute.xlu1 %v4416_v7  ;;  %v3832_v50 = vpop.permute.xlu1 %1425  ;;  %v1210_v41 = vpop.permute.xlu0 %1209  ;;  %v1025_v25 = vsel %vm998_vm4, %v3672_v36, 0.0  ;;  %v1172_v36 = vsel %vm1145_vm5, %v3650_v38, 0.0 }
 0x232   : > { %v1234_v15 = vmul.f32 %v1210_v41, %v1186_v33  ;;  %v1235_v0 = vmul.f32 %v1210_v41, %v1187_v34  ;;  %v971_v49 = vpop.permute.xlu2 %970  ;;  %1503 = vperm.xlu1 %2335, %v3542_v43   ;;  %v1038_v21 = vmul.f32 %v3355_v30, %v1025_v25  ;;  %v1484_v33 = vmul.f32 %v3769_v4, %v1445_v42 }
 0x233   : > { %v3837_v9 = vsel %vm998_vm4, %v971_v49, %v3688_v63  ;;  %v1444_v31 = vsel %vm1439_vm7, %v4429_v53, %v3832_v50  ;;  %v1468_v54 = vsel %vm1439_vm7, %v3832_v50, 0.0 }
 0x234   : > { %v3839_v61 = vadd.f32 %v1234_v15, %v1103_v60  ;;  %v3841_v26 = vadd.f32 %v1235_v0, %v1104_v6  ;;  %v1185_v60 = vmul.f32 %v3605_v27, %v1172_v36 }
 0x239   : > { %1413 = vrot.lane.b32.xlu2 %v3697_v46, %s2459_s18  ;;  %v1059_v43 = vpop.permute.xlu1 %1058  ;;  %v3850_v39 = vpop.permute.xlu0 %1262  ;;  %v1322_v46 = vsel %vm1292_vm6, %v3692_v59, 0.0 }
 0x23a   : > { %v1085_v24 = vmul.f32 %v1059_v43, %v1037_v40  ;;  %v1086_v12 = vmul.f32 %v1059_v43, %v1038_v21  ;;  %v3852_v47 = vpop.permute.xlu2 %1270  ;;  %1411 = vrot.lane.b32.xlu1 %v3620_v28, %s2459_s18  ;;  %v1338_v6 = vmul.f32 %v3638_v22, %v1322_v46  ;;  %s2153_s18 = sshll.u32 %s269_s17, 7 }
 0x23b   : > { %2336 = vset.pattern.permute.xlu1 %v4375_v23  ;;  %v1337_v23 = vmul.f32 %v3640_v62, %v3733_v51  ;;  %s4182_s9 = scalar_lea.vmem [#allocation2], %s2153_s18 }
 0x23c   : > { %v1101_v52 = vadd.f32 %v1085_v24, %v3278_v57  ;;  %v1102_v2 = vadd.f32 %v1086_v12, %v3281_v19  ;;  %v4426_v12 = vld [vmem:[#allocation30_spill] sm:$0xff]  ;;  %s2084_s16 = sshll.u32 %s4182_s9, 4  ;;  %s2085_s16 = int_to_ptr.vmem [resolvable:$true] %s2084_s16 }
 0x241   : > { %1491 = vperm.xlu2 %2334, %v3441_v48   ;;  %v3870_v28 = vpop.permute.xlu0 %1197  ;;  %v1469_v48 = vsel %vm1439_vm7, %v4421_v20, 0.0 }
 0x242   : > { %v1206_v57 = vpop.permute.xlu2 %1205  ;;  %1348 = vperm.xlu1 %2336, %v3726_v58   ;;  %v1365_v19 = vpop.permute.xlu1 %1364  ;;  %v1485_v45 = vmul.f32 %v3778_v8, %v1469_v48 }
 0x243   : > { %v1232_v38 = vmul.f32 %v1206_v57, %v1184_v32  ;;  %v1233_v59 = vmul.f32 %v1206_v57, %v1185_v60  ;;  %v1385_v17 = vmul.f32 %v1365_v19, %v1337_v23  ;;  %v1386_v5 = vmul.f32 %v1365_v19, %v1338_v6  ;;  %v4427_v6 = vld [vmem:[#allocation19_spill] sm:$0xff]  ;;  %v4428_v32 = vld [vmem:[#allocation21_spill] sm:$0xff] }
 0x245   : > { %v3873_v1 = vadd.f32 %v1232_v38, %v1101_v52  ;;  %v3875_v18 = vadd.f32 %v1233_v59, %v1102_v2  ;;  %v1401_v37 = vadd.f32 %v1385_v17, %v4419_v13  ;;  %v1402_v51 = vadd.f32 %v1386_v5, %v4420_v35 }
 0x249   : > { %2338 = vset.pattern.permute.xlu2 %v4424_v11 }
 0x24a   : > { %2337 = vset.pattern.permute.xlu1 %v4416_v7  ;;  %v969_v34 = vpop.permute.xlu1 %968 }
 0x24b   : > { %v999_v41 = vsel %vm998_vm4, %v3817_v3, %v969_v34  ;;  %v1023_v15 = vsel %vm998_vm4, %v969_v34, 0.0  ;;  %v1361_v0 = vpop.permute.xlu0 %1360  ;;  %v1512_v49 = vpop.permute.xlu2 %1511  ;;  %1495 = vperm.xlu1 %2337, %v3726_v58  }
 0x24c   : > { %v1033_v25 = vmul.f32 %v3358_v29, %v999_v41  ;;  %v1034_v21 = vmul.f32 %v3355_v30, %v1023_v15  ;;  %v1383_v40 = vmul.f32 %v1361_v0, %v1335_v56  ;;  %v1384_v43 = vmul.f32 %v1361_v0, %v1336_v44 }
 0x24d   : > { %v1532_v24 = vmul.f32 %v1512_v49, %v1484_v33  ;;  %v1533_v7 = vmul.f32 %v1512_v49, %v1485_v45  ;;  %v1482_v45 = vmul.f32 %v3769_v4, %v1444_v31  ;;  %v1319_v15 = vsel %vm1292_vm6, %v3852_v47, 0.0 }
 0x24e   : > { %v1081_v36 = vmul.f32 %v4426_v12, %v1033_v25  ;;  %v1082_v52 = vmul.f32 %v4426_v12, %v1034_v21  ;;  %v1399_v3 = vadd.f32 %v1383_v40, %v3822_v10  ;;  %v1400_v2 = vadd.f32 %v1384_v43, %v3825_v14 }
 0x24f   : > { %v1548_v46 = vadd.f32 %v1532_v24, %v1401_v37  ;;  %v1549_v60 = vadd.f32 %v1533_v7, %v1402_v51  ;;  %v1317_v10 = vsel %vm1292_vm6, %v3850_v39, 0.0  ;;  %v1332_v50 = vmul.f32 %v3638_v22, %v1319_v15  ;;  %v4434_v15 = vld [vmem:[#allocation16_spill] sm:$0xff] }
 0x250   : > { %v1097_v58 = vadd.f32 %v1081_v36, %v4427_v6  ;;  %v1098_v23 = vadd.f32 %v1082_v52, %v4428_v32  ;;  %v1328_v13 = vmul.f32 %v3638_v22, %v1317_v10 }
 0x252   : > { %v1269_v57 = vpop.permute.xlu1 %1268 }
 0x253   : > { %v1295_v19 = vsel %vm1292_vm6, %v1269_v57, %v3852_v47  ;;  %v3907_v38 = vpop.permute.xlu0 %1409  ;;  %v1116_v59 = vpop.permute.xlu2 %1115  ;;  %2340 = vset.pattern.permute.xlu1 %v4424_v11  ;;  %v1483_v11 = vmul.f32 %v3778_v8, %v1468_v54 }
 0x254   : > { %v1170_v17 = vsel %vm1145_vm5, %v1116_v59, 0.0  ;;  %v1331_v25 = vmul.f32 %v3640_v62, %v1295_v19  ;;  %v1024_v19 = vsel %vm998_vm4, %v3688_v63, 0.0 }
 0x255   : > { %v1181_v14 = vmul.f32 %v3605_v27, %v1170_v17  ;;  %v4430_v17 = vld [vmem:[#allocation12_spill] sm:$0xff] }
 0x257   : > { %v1229_v5 = vmul.f32 %v3870_v28, %v1181_v14 }
 0x259   : > { %v1245_v37 = vadd.f32 %v1229_v5, %v1098_v23  ;;  %v4432_v5 = vld [vmem:[#allocation29_spill] sm:$0xff] }
 0x25a   : > { %v1275_v35 = vpop.permute.xlu1 %1274 }
 0x25b   : > { %v1345_v51 = vpop.permute.xlu0 %1344  ;;  %v3916_v20 = vpop.permute.xlu2 %1415 }
 0x25c   : > { %v1376_v48 = vmul.f32 %v1345_v51, %v1328_v13  ;;  %v1296_v13 = vsel %vm1292_vm6, %v4432_v5, %v1275_v35 }
 0x25e   : > { %v3923_v42 = vadd.f32 %v1376_v48, %v1245_v37  ;;  %v1320_v37 = vsel %vm1292_vm6, %v1275_v35, 0.0  ;;  %v1593_v35 = vld [vmem:[%s4253_s4 + $0x78] sm:$0xff] }
 0x25f   : > { %v1334_v63 = vmul.f32 %v3638_v22, %v1320_v37  ;;  %1671 = vperm.xlu0 %2339, %v1593_v35  }
 0x262   : > { %v1508_v44 = vpop.permute.xlu1 %1507 }
 0x263   : > { %v1530_v55 = vmul.f32 %v1508_v44, %v1482_v45  ;;  %v1531_v56 = vmul.f32 %v1508_v44, %v1483_v11  ;;  %v3927_v34 = vpop.permute.xlu2 %1421  ;;  %v4433_v45 = vld [vmem:[#allocation9_spill] sm:$0xff] }
 0x265   : > { %v1546_v33 = vadd.f32 %v1530_v55, %v1399_v3  ;;  %v1547_v41 = vadd.f32 %v1531_v56, %v1400_v2 }
 0x267   : > { %v1574_v0 = vpack.c.bf16 %v1548_v46, %v1546_v33  ;;  %v1575_v49 = vpack.c.bf16 %v1549_v60, %v1547_v41 }
 0x269   : > { %1744 = vmatpush.bf16.msra.mxu0 %v1574_v0  ;;  %1793 = vmatpush.bf16.msra.mxu1 %v1575_v49  ;;  %v1466_v0 = vsel %vm1439_vm7, %v4434_v15, 0.0  ;;  %v1442_v49 = vsel %vm1439_vm7, %v3916_v20, %v4434_v15  ;;  %v1583_v15 = vld [vmem:[%s4253_s4 + $0x28] sm:$0xff] }
 0x26a   : > { %v1114_v21 = vpop.permute.xlu1 %1113  ;;  %v1479_v20 = vmul.f32 %v3778_v8, %v1466_v0 }
 0x26b   : > { %v1146_v40 = vsel %vm1145_vm5, %v1114_v21, %v1116_v59  ;;  %v1353_v43 = vpop.permute.xlu2 %1352  ;;  %v1467_v21 = vsel %vm1439_vm7, %v3927_v34, 0.0 }
 0x26c   : > { %v1180_v24 = vmul.f32 %v3612_v16, %v1146_v40  ;;  %v1379_v7 = vmul.f32 %v1353_v43, %v1331_v25  ;;  %v1380_v12 = vmul.f32 %v1353_v43, %v1332_v50  ;;  %v1478_v43 = vmul.f32 %v3769_v4, %v1442_v49 }
 0x26e   : > { %v1228_v36 = vmul.f32 %v3870_v28, %v1180_v24  ;;  %v1395_v47 = vadd.f32 %v1379_v7, %v3873_v1  ;;  %v1396_v52 = vadd.f32 %v1380_v12, %v3875_v18  ;;  %v1036_v28 = vmul.f32 %v3355_v30, %v1024_v19 }
 0x26f   : > { %v1035_v1 = vmul.f32 %v3358_v29, %v3837_v9  ;;  %v1481_v24 = vmul.f32 %v3778_v8, %v1467_v21  ;;  %v2228_v21 = vld [vmem:[%s4252_s3 + $0x10] sm:$0xff] }
 0x270   : > { %v1244_v3 = vadd.f32 %v1228_v36, %v1097_v58 }
 0x272   : > { %v1120_v2 = vpop.permute.xlu1 %1119 }
 0x273   : > { %v1261_v46 = vpop.permute.xlu2 %1260  ;;  %v1147_v11 = vsel %vm1145_vm5, %v4433_v45, %v1120_v2  ;;  %v1171_v44 = vsel %vm1145_vm5, %v1120_v2, 0.0 }
 0x274   : > { %v1293_v60 = vsel %vm1292_vm6, %v1261_v46, %v3850_v39  ;;  %v4431_v39 = vld [vmem:[#allocation36_spill] sm:$0xff]  ;;  %v1182_v55 = vmul.f32 %v3612_v16, %v1147_v11  ;;  %v1183_v56 = vmul.f32 %v3605_v27, %v1171_v44  ;;  %v1586_v16 = vld [vmem:[%s4253_s4 + $0x40] sm:$0xff]  ;;  %v1592_v27 = vld [vmem:[%s4253_s4 + $0x70] sm:$0xff] }
 0x275   : > { %v1327_v6 = vmul.f32 %v3640_v62, %v1293_v60  ;;  %1666 = vperm.xlu2 %2338, %v1592_v27   ;;  %1636 = vperm.xlu0 %2339, %v1586_v16  }
 0x277   : > { %v1375_v32 = vmul.f32 %v1345_v51, %v1327_v6  ;;  %v1333_v51 = vmul.f32 %v3640_v62, %v1296_v13 }
 0x279   : > { %v3941_v23 = vadd.f32 %v1375_v32, %v1244_v3 }
 0x27a   : > { %v1420_v57 = vpop.permute.xlu1 %1419 }
 0x27b   : > { %v1267_v31 = vpop.permute.xlu2 %1266  ;;  %v1443_v40 = vsel %vm1439_vm7, %v1420_v57, %v3927_v34  ;;  %v1590_v34 = vld [vmem:[%s4253_s4 + $0x60] sm:$0xff]  ;;  %v1585_v57 = vld [vmem:[%s4253_s4 + $0x38] sm:$0xff] }
 0x27c   : > { %v1480_v7 = vmul.f32 %v3769_v4, %v1443_v40  ;;  %1656 = vperm.xlu1 %2340, %v1590_v34   ;;  %v1318_v5 = vsel %vm1292_vm6, %v1267_v31, 0.0  ;;  %v2229_v40 = vld [vmem:[%s4252_s3 + $0x18] sm:$0xff]  ;;  %v1897_v34 = vld [vmem:[%s4255_s6 + $0x20] sm:$0xff] }
 0x27d   : > { %1631 = vperm.xlu0 %2339, %v1585_v57  }
 0x282   : > { %v1055_v18 = vpop.permute.xlu1 %1054 }
 0x283   : > { %v1083_v58 = vmul.f32 %v1055_v18, %v1035_v1  ;;  %v1084_v59 = vmul.f32 %v1055_v18, %v1036_v28  ;;  %v1500_v33 = vpop.permute.xlu2 %1499  ;;  %v1591_v1 = vld [vmem:[%s4253_s4 + $0x68] sm:$0xff] }
 0x284   : > { %v1526_v12 = vmul.f32 %v1500_v33, %v1478_v43  ;;  %v1527_v36 = vmul.f32 %v1500_v33, %v1479_v20  ;;  %1661 = vperm.xlu2 %2338, %v1591_v1   ;;  %v2230_v20 = vld [vmem:[%s4252_s3 + $0x20] sm:$0xff]  ;;  %v2233_v1 = vld [vmem:[%s4252_s3 + $0x38] sm:$0xff] }
 0x285   : > { %v1099_v10 = vadd.f32 %v1083_v58, %v4430_v17  ;;  %v1100_v14 = vadd.f32 %v1084_v59, %v4431_v39  ;;  %v1580_v59 = vld [vmem:[%s4253_s4 + $0x10] sm:$0xff]  ;;  %v1589_v17 = vld [vmem:[%s4253_s4 + $0x58] sm:$0xff]  ;;  %v1464_v39 = vsel %vm1439_vm7, %v3907_v38, 0.0  ;;  %v1893_v43 = vld [vmem:[%s4255_s6] sm:$0xff] }
 0x286   : > { %v1542_v6 = vadd.f32 %v1526_v12, %v1395_v47  ;;  %v1543_v19 = vadd.f32 %v1527_v36, %v1396_v52  ;;  %v1588_v52 = vld [vmem:[%s4253_s4 + $0x50] sm:$0xff]  ;;  %1606 = vperm.xlu0 %2339, %v1580_v59   ;;  %v1896_v12 = vld [vmem:[%s4255_s6 + $0x18] sm:$0xff] }
 0x287   : > { %1646 = vperm.xlu1 %2340, %v1588_v52   ;;  %v1895_v36 = vld [vmem:[%s4255_s6 + $0x10] sm:$0xff] }
 0x28b   : > { %v1357_v30 = vpop.permute.xlu1 %1356  ;;  %v1408_v2 = vpop.permute.xlu2 %1407 }
 0x28c   : > { %v1381_v48 = vmul.f32 %v1357_v30, %v1333_v51  ;;  %v1382_v53 = vmul.f32 %v1357_v30, %v1334_v63  ;;  %1651 = vperm.xlu2 %2338, %v1589_v17   ;;  %v1440_v13 = vsel %vm1439_vm7, %v1408_v2, %v3907_v38  ;;  %v1475_v51 = vmul.f32 %v3778_v8, %v1464_v39  ;;  %v1587_v63 = vld [vmem:[%s4253_s4 + $0x48] sm:$0xff] }
 0x28d   : > { %v1579_v30 = vld [vmem:[%s4253_s4 + $0x8] sm:$0xff]  ;;  %v1474_v38 = vmul.f32 %v3769_v4, %v1440_v13 }
 0x28e   : > { %v1397_v29 = vadd.f32 %v1381_v48, %v3839_v61  ;;  %v1398_v9 = vadd.f32 %v1382_v53, %v3841_v26  ;;  %v1584_v48 = vld [vmem:[%s4253_s4 + $0x30] sm:$0xff]  ;;  %v1330_v53 = vmul.f32 %v3638_v22, %v1318_v5  ;;  %1601 = vperm.xlu0 %2339, %v1579_v30  }
 0x28f   : > { %1641 = vperm.xlu1 %2340, %v1587_v63  }
 0x293   : > { %v1265_v54 = vpop.permute.xlu1 %1264 }
 0x294   : > { %v1294_v37 = vsel %vm1292_vm6, %v1265_v54, %v1267_v31  ;;  %1626 = vperm.xlu2 %2338, %v1584_v48  }
 0x296   : > { %1913 = vperm.xlu0 %2339, %v1895_v36  }
 0x29b   : > { %v1202_v61 = vpop.permute.xlu1 %1201 }
 0x29c   : > { %v1230_v41 = vmul.f32 %v1202_v61, %v1182_v55  ;;  %v1231_v26 = vmul.f32 %v1202_v61, %v1183_v56  ;;  %1621 = vperm.xlu2 %2338, %v1583_v15  }
 0x29e   : > { %v3970_v50 = vadd.f32 %v1230_v41, %v1099_v10  ;;  %v3972_v25 = vadd.f32 %v1231_v26, %v1100_v14  ;;  %v1414_v10 = vpop.permute.xlu2 %1413 }
 0x2a4   : > { %v1504_v3 = vpop.permute.xlu1 %1503 }
 0x2a5   : > { %v1528_v46 = vmul.f32 %v1504_v3, %v1480_v7  ;;  %v1529_v60 = vmul.f32 %v1504_v3, %v1481_v24  ;;  %v2231_v24 = vld [vmem:[%s4252_s3 + $0x28] sm:$0xff]  ;;  %v1899_v3 = vld [vmem:[%s4255_s6 + $0x30] sm:$0xff] }
 0x2a6   : > { %v1492_v31 = vpop.permute.xlu2 %1491 }
 0x2a7   : > { %v1544_v32 = vadd.f32 %v1528_v46, %v1397_v29  ;;  %v1545_v28 = vadd.f32 %v1529_v60, %v1398_v9  ;;  %v1329_v29 = vmul.f32 %v3640_v62, %v1294_v37  ;;  %v1465_v9 = vsel %vm1439_vm7, %v1414_v10, 0.0  ;;  %v1582_v62 = vld [vmem:[%s4253_s4 + $0x20] sm:$0xff]  ;;  %v2232_v60 = vld [vmem:[%s4252_s3 + $0x30] sm:$0xff] }
 0x2a8   : > { %v1477_v44 = vmul.f32 %v3778_v8, %v1465_v9  ;;  %v1522_v35 = vmul.f32 %v1492_v31, %v1474_v38  ;;  %v1523_v55 = vmul.f32 %v1492_v31, %v1475_v51  ;;  %1616 = vperm.xlu1 %2340, %v1582_v62  }
 0x2a9   : > { %v1572_v18 = vpack.c.bf16 %v1544_v32, %v1542_v6  ;;  %v1573_v58 = vpack.c.bf16 %v1545_v28, %v1543_v19  ;;  %v1898_v6 = vld [vmem:[%s4255_s6 + $0x28] sm:$0xff] }
 0x2aa   : > { %v1538_v8 = vadd.f32 %v1522_v35, %v3941_v23  ;;  %v1578_v23 = vld [vmem:[%s4253_s4] sm:$0xff]  ;;  %v1894_v32 = vld [vmem:[%s4255_s6 + $0x8] sm:$0xff]  ;;  %1928 = vperm.xlu0 %2339, %v1898_v6  }
 0x2ab   : > { %1745 = vmatpush.bf16.msra.mxu0 %v1572_v18  ;;  %1794 = vmatpush.bf16.msra.mxu1 %v1573_v58 }
 0x2ac   : > { %v1412_v47 = vpop.permute.xlu1 %1411  ;;  %1596 = vperm.xlu2 %2338, %v1578_v23  }
 0x2ad   : > { %v1441_v54 = vsel %vm1439_vm7, %v1412_v47, %v1414_v10  ;;  %v1900_v47 = vld [vmem:[%s4255_s6 + $0x38] sm:$0xff] }
 0x2ae   : > { %v1476_v22 = vmul.f32 %v3769_v4, %v1441_v54  ;;  %v1539_v4 = vadd.f32 %v1523_v55, %v3923_v42  ;;  %v1581_v42 = vld [vmem:[%s4253_s4 + $0x18] sm:$0xff] }
 0x2b0   : > { %1611 = vperm.xlu1 %2340, %v1581_v42  }
 0x2b4   : > { %v1349_v14 = vpop.permute.xlu1 %1348  ;;  %1908 = vperm.xlu2 %2338, %v1894_v32  }
 0x2b5   : > { %v1377_v45 = vmul.f32 %v1349_v14, %v1329_v29  ;;  %v1378_v11 = vmul.f32 %v1349_v14, %v1330_v53 }
 0x2b7   : > { %v1393_v33 = vadd.f32 %v1377_v45, %v3970_v50  ;;  %v1394_v61 = vadd.f32 %v1378_v11, %v3972_v25  ;;  %v2226_v50 = vld [vmem:[%s4252_s3] sm:$0xff]  ;;  %v2227_v25 = vld [vmem:[%s4252_s3 + $0x8] sm:$0xff] }
 0x2b8   : > { %1903 = vperm.xlu1 %2340, %v1893_v43  }
 0x2bc   : > { %1923 = vperm.xlu2 %2338, %v1897_v34  }
 0x2bd   : > { %v1496_v56 = vpop.permute.xlu1 %1495 }
 0x2be   : > { %v1524_v41 = vmul.f32 %v1496_v56, %v1476_v22  ;;  %v1525_v26 = vmul.f32 %v1496_v56, %v1477_v44 }
 0x2c0   : > { %v1540_v0 = vadd.f32 %v1524_v41, %v1393_v33  ;;  %v1541_v49 = vadd.f32 %v1525_v26, %v1394_v61  ;;  %1918 = vperm.xlu1 %2340, %v1896_v12  }
 0x2c2   : > { %v1570_v16 = vpack.c.bf16 %v1540_v0, %v1538_v8  ;;  %v1571_v27 = vpack.c.bf16 %v1541_v49, %v1539_v4 }
 0x2c4   : > { %1746 = vmatpush.bf16.msra.mxu0 %v1570_v16  ;;  %1795 = vmatpush.bf16.msra.mxu1 %v1571_v27 }
 0x2c5   : > { %1938 = vperm.xlu2 %2338, %v1900_v47  }
 0x2c7   : > { %2188 = vmatmul.msk.bf16.vlgmr.msra.gmra.mxu0 %vm1714_vm8, %v2226_v50  ;;  %2196 = vmatmul.msk.bf16.vlgmr.msra.gmra.mxu1 %vm1714_vm8, %v2226_v50 }
 0x2c8   : > { %1933 = vperm.xlu1 %2340, %v1899_v3  }
 0x2cf   : > { %v4076_v7 = vpop.permute.xlu2 %1666 }
 0x2d1   : > { %v4091_v46 = vpop.permute.xlu0 %1671 }
 0x2d7   : > { %2189 = vmatmul.msk.bf16.gmra.mxu0 %vm1714_vm8, %v2227_v25  ;;  %2197 = vmatmul.msk.bf16.gmra.mxu1 %vm1714_vm8, %v2227_v25 }
 0x2de   : > { %v4089_v2 = vpop.permute.xlu2 %1661 }
 0x2e6   : > { %v4104_v19 = vpop.permute.xlu2 %1651 }
 0x2e7   : > { %2190 = vmatmul.msk.bf16.gmra.mxu0 %vm1714_vm8, %v2228_v21  ;;  %2198 = vmatmul.msk.bf16.gmra.mxu1 %vm1714_vm8, %v2228_v21  ;;  %v4106_v28 = vpop.permute.xlu0 %1636 }
 0x2ee   : > { %v4111_v57 = vpop.permute.xlu1 %1656  ;;  %v1627_v18 = vpop.permute.xlu2 %1626 }
 0x2ef   : > { %v1632_v58 = vpop.permute.xlu0 %1631 }
 0x2f6   : > { %v1622_v59 = vpop.permute.xlu2 %1621 }
 0x2f7   : > { %2191 = vmatmul.msk.bf16.gmra.mxu0 %vm1714_vm8, %v2229_v40  ;;  %2199 = vmatmul.msk.bf16.gmra.mxu1 %vm1714_vm8, %v2229_v40 }
 0x2f8   : > { %v1607_v17 = vpop.permute.xlu0 %1606 }
 0x2f9   : > { %v4121_v52 = vpop.permute.xlu1 %1646 }
 0x300   : > { %v1602_v13 = vpop.permute.xlu0 %1601 }
 0x301   : > { %v4123_v14 = vpop.permute.xlu1 %1641 }
 0x306   : > { %v1597_v5 = vpop.permute.xlu2 %1596 }
 0x307   : > { %2192 = vmatmul.msk.bf16.gmra.mxu0 %vm1714_vm8, %v2230_v20  ;;  %2200 = vmatmul.msk.bf16.gmra.mxu1 %vm1714_vm8, %v2230_v20 }
 0x317   : > { %2193 = vmatmul.msk.bf16.gmra.mxu0 %vm1714_vm8, %v2231_v24  ;;  %2201 = vmatmul.msk.bf16.gmra.mxu1 %vm1714_vm8, %v2231_v24 }
 0x31a   : > { %v1617_v54 = vpop.permute.xlu1 %1616 }
 0x322   : > { %v1612_v55 = vpop.permute.xlu1 %1611 }
 0x327   : > { %2194 = vmatmul.msk.bf16.gmra.mxu0 %vm1714_vm8, %v2232_v60  ;;  %2202 = vmatmul.msk.bf16.gmra.mxu1 %vm1714_vm8, %v2232_v60 }
 0x337   : > { %2195 = vmatmul.msk.bf16.gmra.mxu0 %vm1714_vm8, %v2233_v1  ;;  %2203 = vmatmul.msk.bf16.gmra.mxu1 %vm1714_vm8, %v2233_v1 }
 0x344   : > { %v1797_v10 = vpop.f32.mrf.mxu1  ;;  %v1748_v39 = vpop.f32.mrf.mxu0 }
 0x345   : > { %v1798_v37 = vadd.f32 %v1797_v10, %v1597_v5  ;;  %v1749_v51 = vadd.f32 %v1748_v39, %v1597_v5 }
 0x347   : > { %v1838_v38 = vmax.f32 %v1798_v37, 0.0  ;;  %v1837_v29 = vmax.f32 %v1749_v51, 0.0 }
 0x34c   : > { %v1750_v63 = vpop.f32.mrf.mxu0  ;;  %v1799_v30 = vpop.f32.mrf.mxu1 }
 0x34d   : > { %v1751_v48 = vadd.f32 %v1750_v63, %v1602_v13  ;;  %v1800_v53 = vadd.f32 %v1799_v30, %v1602_v13 }
 0x34f   : > { %v1839_v9 = vmax.f32 %v1751_v48, 0.0  ;;  %v1840_v31 = vmax.f32 %v1800_v53, 0.0 }
 0x351   : > { %v4125_v45 = vpack.c.bf16 %v1839_v9, %v1837_v29  ;;  %v4127_v11 = vpack.c.bf16 %v1840_v31, %v1838_v38 }
 0x354   : > { %v1753_v44 = vpop.f32.mrf.mxu0  ;;  %v1802_v35 = vpop.f32.mrf.mxu1 }
 0x355   : > { %v1754_v22 = vadd.f32 %v1753_v44, %v1607_v17  ;;  %v1803_v56 = vadd.f32 %v1802_v35, %v1607_v17 }
 0x357   : > { %v1841_v26 = vmax.f32 %v1754_v22, 0.0  ;;  %v1842_v15 = vmax.f32 %v1803_v56, 0.0 }
 0x35c   : > { %v1755_v62 = vpop.f32.mrf.mxu0  ;;  %v1804_v33 = vpop.f32.mrf.mxu1 }
 0x35d   : > { %v1756_v61 = vadd.f32 %v1755_v62, %v1612_v55  ;;  %v1805_v41 = vadd.f32 %v1804_v33, %v1612_v55 }
 0x35f   : > { %v1843_v8 = vmax.f32 %v1756_v61, 0.0  ;;  %v1844_v0 = vmax.f32 %v1805_v41, 0.0 }
 0x361   : > { %v4129_v4 = vpack.c.bf16 %v1843_v8, %v1841_v26  ;;  %v4131_v49 = vpack.c.bf16 %v1844_v0, %v1842_v15 }
 0x364   : > { %v1758_v16 = vpop.f32.mrf.mxu0  ;;  %v1807_v27 = vpop.f32.mrf.mxu1 }
 0x365   : > { %v1759_v50 = vadd.f32 %v1758_v16, %v1617_v54  ;;  %v1808_v42 = vadd.f32 %v1807_v27, %v1617_v54 }
 0x367   : > { %v1845_v20 = vmax.f32 %v1759_v50, 0.0  ;;  %v1846_v43 = vmax.f32 %v1808_v42, 0.0 }
 0x36c   : > { %v1760_v23 = vpop.f32.mrf.mxu0  ;;  %v1809_v25 = vpop.f32.mrf.mxu1 }
 0x36d   : > { %v1761_v21 = vadd.f32 %v1760_v23, %v1622_v59  ;;  %v1810_v40 = vadd.f32 %v1809_v25, %v1622_v59 }
 0x36f   : > { %v1847_v24 = vmax.f32 %v1761_v21, 0.0  ;;  %v1848_v12 = vmax.f32 %v1810_v40, 0.0 }
 0x371   : > { %v4133_v36 = vpack.c.bf16 %v1847_v24, %v1845_v20  ;;  %v4135_v3 = vpack.c.bf16 %v1848_v12, %v1846_v43 }
 0x374   : > { %v1763_v60 = vpop.f32.mrf.mxu0  ;;  %v1812_v6 = vpop.f32.mrf.mxu1 }
 0x375   : > { %v1764_v32 = vadd.f32 %v1763_v60, %v1627_v18  ;;  %v1813_v34 = vadd.f32 %v1812_v6, %v1627_v18 }
 0x377   : > { %v1849_v39 = vmax.f32 %v1764_v32, 0.0  ;;  %v1850_v5 = vmax.f32 %v1813_v34, 0.0 }
 0x37c   : > { %v1765_v1 = vpop.f32.mrf.mxu0  ;;  %v1814_v47 = vpop.f32.mrf.mxu1 }
 0x37d   : > { %v1766_v17 = vadd.f32 %v1765_v1, %v1632_v58  ;;  %v1815_v10 = vadd.f32 %v1814_v47, %v1632_v58 }
 0x37f   : > { %v1851_v13 = vmax.f32 %v1766_v17, 0.0  ;;  %v1852_v59 = vmax.f32 %v1815_v10, 0.0 }
 0x381   : > { %v4137_v37 = vpack.c.bf16 %v1851_v13, %v1849_v39  ;;  %v4139_v51 = vpack.c.bf16 %v1852_v59, %v1850_v5 }
 0x384   : > { %v1768_v63 = vpop.f32.mrf.mxu0  ;;  %v1817_v30 = vpop.f32.mrf.mxu1 }
 0x385   : > { %v1769_v34 = vadd.f32 %v1768_v63, %v4106_v28  ;;  %v1818_v1 = vadd.f32 %v1817_v30, %v4106_v28  ;;  %v2234_v28 = vld [vmem:[%s4254_s5] sm:$0xff] }
 0x386   : > { %v2366_v63 = vld [vmem:[%s2593_s15] sm:$0xff] }
 0x387   : > { %v1853_v13 = vmax.f32 %v1769_v34, 0.0  ;;  %v1854_v59 = vmax.f32 %v1818_v1, 0.0  ;;  %v2374_v1 = vld [vmem:[%s2593_s15 + $0x40] sm:$0xff] }
 0x38c   : > { %v1770_v48 = vpop.f32.mrf.mxu0  ;;  %v1819_v53 = vpop.f32.mrf.mxu1 }
 0x38d   : > { %v1820_v12 = vadd.f32 %v1819_v53, %v4123_v14  ;;  %v2367_v53 = vld [vmem:[%s2593_s15 + $0x8] sm:$0xff] }
 0x38f   : > { %v1856_v10 = vmax.f32 %v1820_v12, 0.0 }
 0x394   : > { %v1773_v38 = vpop.f32.mrf.mxu0  ;;  %v1822_v29 = vpop.f32.mrf.mxu1 }
 0x395   : > { %v1774_v20 = vadd.f32 %v1773_v38, %v4121_v52 }
 0x397   : > { %v1857_v47 = vmax.f32 %v1774_v20, 0.0  ;;  %v2372_v20 = vld [vmem:[%s2593_s15 + $0x30] sm:$0xff] }
 0x39c   : > { %v1775_v9 = vpop.f32.mrf.mxu0  ;;  %v1824_v18 = vpop.f32.mrf.mxu1 }
 0x39d   : > { %v1825_v23 = vadd.f32 %v1824_v18, %v4104_v19  ;;  %v1909_v18 = vpop.permute.xlu2 %1908 }
 0x39f   : > { %v1860_v6 = vmax.f32 %v1825_v23, 0.0 }
 0x3a4   : > { %v1778_v31 = vpop.f32.mrf.mxu0  ;;  %v1827_v54 = vpop.f32.mrf.mxu1 }
 0x3a5   : > { %v1779_v8 = vadd.f32 %v1778_v31, %v4111_v57  ;;  %v1828_v0 = vadd.f32 %v1827_v54, %v4111_v57  ;;  %v1771_v57 = vadd.f32 %v1770_v48, %v4123_v14  ;;  %v1886_v48 = vpack.c.bf16 %v1856_v10, %v1854_v59 }
 0x3a7   : > { %v1861_v43 = vmax.f32 %v1779_v8, 0.0  ;;  %v1862_v24 = vmax.f32 %v1828_v0, 0.0  ;;  %v2370_v0 = vld [vmem:[%s2593_s15 + $0x20] sm:$0xff] }
 0x3ac   : > { %v1780_v44 = vpop.f32.mrf.mxu0  ;;  %v1829_v58 = vpop.f32.mrf.mxu1 }
 0x3ad   : > { %v1781_v61 = vadd.f32 %v1780_v44, %v4089_v2  ;;  %v1830_v41 = vadd.f32 %v1829_v58, %v4089_v2 }
 0x3af   : > { %v1863_v25 = vmax.f32 %v1781_v61, 0.0  ;;  %v1864_v21 = vmax.f32 %v1830_v41, 0.0  ;;  %v1914_v61 = vpop.permute.xlu0 %1913 }
 0x3b1   : > { %v1889_v32 = vpack.c.bf16 %v1863_v25, %v1861_v43  ;;  %v2373_v43 = vld [vmem:[%s2593_s15 + $0x38] sm:$0xff] }
 0x3b4   : > { %v1783_v35 = vpop.f32.mrf.mxu0  ;;  %v1832_v55 = vpop.f32.mrf.mxu1 }
 0x3b5   : > { %v1784_v22 = vadd.f32 %v1783_v35, %v4076_v7  ;;  %v1833_v56 = vadd.f32 %v1832_v55, %v4076_v7  ;;  %v1776_v7 = vadd.f32 %v1775_v9, %v4104_v19  ;;  %v1890_v19 = vpack.c.bf16 %v1864_v21, %v1862_v24  ;;  %v2368_v35 = vld [vmem:[%s2593_s15 + $0x10] sm:$0xff] }
 0x3b7   : > { %v1865_v16 = vmax.f32 %v1784_v22, 0.0  ;;  %v1866_v27 = vmax.f32 %v1833_v56, 0.0  ;;  %v1859_v60 = vmax.f32 %v1776_v7, 0.0  ;;  %v2369_v22 = vld [vmem:[%s2593_s15 + $0x18] sm:$0xff] }
 0x3b9   : > { %v1887_v39 = vpack.c.bf16 %v1859_v60, %v1857_v47  ;;  %v1924_v60 = vpop.permute.xlu2 %1923 }
 0x3bc   : > { %v1785_v62 = vpop.f32.mrf.mxu0  ;;  %v1834_v33 = vpop.f32.mrf.mxu1 }
 0x3bd   : > { %v1786_v26 = vadd.f32 %v1785_v62, %v4091_v46  ;;  %v1835_v15 = vadd.f32 %v1834_v33, %v4091_v46  ;;  %v1823_v46 = vadd.f32 %v1822_v29, %v4121_v52  ;;  %v1855_v52 = vmax.f32 %v1771_v57, 0.0 }
 0x3bf   : > { %v1867_v50 = vmax.f32 %v1786_v26, 0.0  ;;  %v1868_v42 = vmax.f32 %v1835_v15, 0.0  ;;  %v1858_v17 = vmax.f32 %v1823_v46, 0.0  ;;  %v1885_v14 = vpack.c.bf16 %v1855_v52, %v1853_v13 }
 0x3c1   : > { %v1891_v40 = vpack.c.bf16 %v1867_v50, %v1865_v16  ;;  %v1892_v2 = vpack.c.bf16 %v1868_v42, %v1866_v27  ;;  %v1888_v5 = vpack.c.bf16 %v1860_v6, %v1858_v17  ;;  %v2371_v27 = vld [vmem:[%s2593_s15 + $0x28] sm:$0xff] }
 0x3c2   : > { %v2375_v17 = vld [vmem:[%s2593_s15 + $0x48] sm:$0xff] }
 0x3c3   : > { %1965 = vmatpush.bf16.msra.mxu2 %v1891_v40  ;;  %1994 = vmatpush.bf16.msra.mxu3 %v1892_v2 }
 0x3c7   : > { %1966 = vmatpush.bf16.msra.mxu2 %v1889_v32  ;;  %1995 = vmatpush.bf16.msra.mxu3 %v1890_v19 }
 0x3cb   : > { %1967 = vmatpush.bf16.msra.mxu2 %v1887_v39  ;;  %1996 = vmatpush.bf16.msra.mxu3 %v1888_v5  ;;  %v1929_v5 = vpop.permute.xlu0 %1928 }
 0x3cf   : > { %1968 = vmatpush.bf16.msra.mxu2 %v1885_v14  ;;  %1997 = vmatpush.bf16.msra.mxu3 %v1886_v48 }
 0x3d3   : > { %1969 = vmatpush.bf16.msra.mxu2 %v4137_v37  ;;  %1998 = vmatpush.bf16.msra.mxu3 %v4139_v51 }
 0x3d7   : > { %1970 = vmatpush.bf16.msra.mxu2 %v4133_v36  ;;  %1999 = vmatpush.bf16.msra.mxu3 %v4135_v3  ;;  %v2235_v36 = vld [vmem:[%s4254_s5 + $0x8] sm:$0xff] }
 0x3db   : > { %1971 = vmatpush.bf16.msra.mxu2 %v4129_v4  ;;  %2000 = vmatpush.bf16.msra.mxu3 %v4131_v49  ;;  %v2236_v4 = vld [vmem:[%s4254_s5 + $0x10] sm:$0xff] }
 0x3df   : > { %1972 = vmatpush.bf16.msra.mxu2 %v4125_v45  ;;  %2001 = vmatpush.bf16.msra.mxu3 %v4127_v11  ;;  %v2237_v45 = vld [vmem:[%s4254_s5 + $0x18] sm:$0xff]  ;;  %v1904_v11 = vpop.permute.xlu1 %1903 }
 0x3e2   : > { %1973 = vmatmul.bf16.vlgmr.msra.gmra.mxu2 %v2234_v28  ;;  %2002 = vmatmul.bf16.vlgmr.msra.gmra.mxu3 %v2234_v28  ;;  %v2376_v28 = vld [vmem:[%s2593_s15 + $0x50] sm:$0xff] }
 0x3e7   : > { %v1919_v23 = vpop.permute.xlu1 %1918 }
 0x3f2   : > { %1978 = vmatmul.bf16.gmra.mxu2 %v2235_v36  ;;  %2007 = vmatmul.bf16.gmra.mxu3 %v2235_v36 }
 0x402   : > { %1983 = vmatmul.bf16.gmra.mxu2 %v2236_v4  ;;  %2012 = vmatmul.bf16.gmra.mxu3 %v2236_v4  ;;  %v2377_v4 = vld [vmem:[%s2593_s15 + $0x58] sm:$0xff] }
 0x412   : > { %1988 = vmatmul.bf16.gmra.mxu2 %v2237_v45  ;;  %2017 = vmatmul.bf16.gmra.mxu3 %v2237_v45 }
 0x465   : > { %v1974_v49 = vpop.f32.mrf.mxu2  ;;  %v2003_v3 = vpop.f32.mrf.mxu3 }
 0x466   : > { %v1975_v37 = vadd.f32 %v1974_v49, %v1904_v11  ;;  %v2004_v51 = vadd.f32 %v2003_v3, %v1904_v11  ;;  %v1934_v3 = vpop.permute.xlu1 %1933 }
 0x468   : > { %v2023_v30 = vadd.f32 %v2366_v63, %v1975_v37  ;;  %v2024_v38 = vadd.f32 %v2367_v53, %v2004_v51  ;;  %v2378_v53 = vld [vmem:[%s2593_s15 + $0x60] sm:$0xff] }
 0x46a   : > { %v2039_v29 = vmax.f32 %v2023_v30, 0.0  ;;  %v2040_v9 = vmax.f32 %v2024_v38, 0.0 }
 0x46c   : > { %2055 = vst [vmem:[%s4182_s9] sm:$0xff] %v2039_v29  ;;  %v2379_v29 = vld [vmem:[%s2593_s15 + $0x68] sm:$0xff] }
 0x46d   : > { %2056 = vst [vmem:[%s4182_s9 + $0x8] sm:$0xff] %v2040_v9  ;;  %v1976_v31 = vpop.f32.mrf.mxu2  ;;  %v2005_v54 = vpop.f32.mrf.mxu3 }
 0x46e   : > { %v1977_v44 = vadd.f32 %v1976_v31, %v1909_v18  ;;  %v2006_v58 = vadd.f32 %v2005_v54, %v1909_v18  ;;  %v1939_v54 = vpop.permute.xlu2 %1938 }
 0x470   : > { %v2025_v55 = vadd.f32 %v2368_v35, %v1977_v44  ;;  %v2026_v56 = vadd.f32 %v2369_v22, %v2006_v58  ;;  %v2380_v22 = vld [vmem:[%s2593_s15 + $0x70] sm:$0xff] }
 0x472   : > { %v2041_v62 = vmax.f32 %v2025_v55, 0.0  ;;  %v2042_v33 = vmax.f32 %v2026_v56, 0.0 }
 0x474   : > { %2057 = vst [vmem:[%s4182_s9 + $0x10] sm:$0xff] %v2041_v62  ;;  %v2381_v62 = vld [vmem:[%s2593_s15 + $0x78] sm:$0xff]  ;;  %s2402_s15 = scalar_lea.hbm %s4256_s7, 256 }
 0x475   : > { %2058 = vst [vmem:[%s4182_s9 + $0x18] sm:$0xff] %v2042_v33  ;;  %v1979_v41 = vpop.f32.mrf.mxu2  ;;  %v2008_v26 = vpop.f32.mrf.mxu3  ;;  %p2404_p1 = scmp.lt.s32.totalorder %s2402_s15, %s2398_s29 }
 0x476   : > { %v1980_v15 = vadd.f32 %v1979_v41, %v1914_v61  ;;  %v2009_v8 = vadd.f32 %v2008_v26, %v1914_v61 }
 0x477   : > { %p2405_p2 = por %p2404_p1, %p2403_p0 }
 0x478   : > { %v2027_v16 = vadd.f32 %v2370_v0, %v1980_v15  ;;  %v2028_v50 = vadd.f32 %v2371_v27, %v2009_v8 }
 0x479   : > { %p2406_p3 = pnand %p2405_p2, %p2401_p13 }
 0x47a   : > { %v2043_v42 = vmax.f32 %v2027_v16, 0.0  ;;  %v2044_v7 = vmax.f32 %v2028_v50, 0.0 }
 0x47c   : > { %2059 = vst [vmem:[%s4182_s9 + $0x20] sm:$0xff] %v2043_v42 }
 0x47d   : > { %2060 = vst [vmem:[%s4182_s9 + $0x28] sm:$0xff] %v2044_v7  ;;  %v1981_v25 = vpop.f32.mrf.mxu2  ;;  %v2010_v21 = vpop.f32.mrf.mxu3 }
 0x47e   : > { %v1982_v40 = vadd.f32 %v1981_v25, %v1919_v23  ;;  %v2011_v2 = vadd.f32 %v2010_v21, %v1919_v23 }
 0x480   : > { %v2029_v46 = vadd.f32 %v2372_v20, %v1982_v40  ;;  %v2030_v24 = vadd.f32 %v2373_v43, %v2011_v2 }
 0x482   : > { %v2045_v57 = vmax.f32 %v2029_v46, 0.0  ;;  %v2046_v12 = vmax.f32 %v2030_v24, 0.0 }
 0x484   : > { %2061 = vst [vmem:[%s4182_s9 + $0x30] sm:$0xff] %v2045_v57 }
 0x485   : > { %2062 = vst [vmem:[%s4182_s9 + $0x38] sm:$0xff] %v2046_v12  ;;  %v1984_v6 = vpop.f32.mrf.mxu2  ;;  %v2013_v32 = vpop.f32.mrf.mxu3 }
 0x486   : > { %v1985_v19 = vadd.f32 %v1984_v6, %v1924_v60  ;;  %v2014_v34 = vadd.f32 %v2013_v32, %v1924_v60 }
 0x488   : > { %v2031_v47 = vadd.f32 %v2374_v1, %v1985_v19  ;;  %v2032_v52 = vadd.f32 %v2375_v17, %v2014_v34 }
 0x48a   : > { %v2047_v10 = vmax.f32 %v2031_v47, 0.0  ;;  %v2048_v39 = vmax.f32 %v2032_v52, 0.0 }
 0x48c   : > { %2063 = vst [vmem:[%s4182_s9 + $0x40] sm:$0xff] %v2047_v10 }
 0x48d   : > { %2064 = vst [vmem:[%s4182_s9 + $0x48] sm:$0xff] %v2048_v39  ;;  %v1986_v13 = vpop.f32.mrf.mxu2  ;;  %v2015_v59 = vpop.f32.mrf.mxu3 }
 0x48e   : > { %v1987_v14 = vadd.f32 %v1986_v13, %v1929_v5  ;;  %v2016_v48 = vadd.f32 %v2015_v59, %v1929_v5 }
 0x490   : > { %v2033_v36 = vadd.f32 %v2376_v28, %v1987_v14  ;;  %v2034_v45 = vadd.f32 %v2377_v4, %v2016_v48 }
 0x492   : > { %v2049_v11 = vmax.f32 %v2033_v36, 0.0  ;;  %v2050_v49 = vmax.f32 %v2034_v45, 0.0 }
 0x494   : > { %2065 = vst [vmem:[%s4182_s9 + $0x50] sm:$0xff] %v2049_v11 }
 0x495   : > { %2066 = vst [vmem:[%s4182_s9 + $0x58] sm:$0xff] %v2050_v49  ;;  %v1989_v37 = vpop.f32.mrf.mxu2  ;;  %v2018_v51 = vpop.f32.mrf.mxu3 }
 0x496   : > { %v1990_v63 = vadd.f32 %v1989_v37, %v1934_v3  ;;  %v2019_v30 = vadd.f32 %v2018_v51, %v1934_v3 }
 0x498   : > { %v2035_v38 = vadd.f32 %v2378_v53, %v1990_v63  ;;  %v2036_v9 = vadd.f32 %v2379_v29, %v2019_v30 }
 0x49a   : > { %v2051_v18 = vmax.f32 %v2035_v38, 0.0  ;;  %v2052_v31 = vmax.f32 %v2036_v9, 0.0 }
 0x49c   : > { %2067 = vst [vmem:[%s4182_s9 + $0x60] sm:$0xff] %v2051_v18 }
 0x49d   : > { %2068 = vst [vmem:[%s4182_s9 + $0x68] sm:$0xff] %v2052_v31  ;;  %v1991_v44 = vpop.f32.mrf.mxu2  ;;  %v2020_v58 = vpop.f32.mrf.mxu3 }
 0x49e   : > { %v1992_v35 = vadd.f32 %v1991_v44, %v1939_v54  ;;  %v2021_v55 = vadd.f32 %v2020_v58, %v1939_v54 }
 0x4a0   : > { %v2037_v56 = vadd.f32 %v2380_v22, %v1992_v35  ;;  %v2038_v33 = vadd.f32 %v2381_v62, %v2021_v55 }
 0x4a2   : > { %v2053_v61 = vmax.f32 %v2037_v56, 0.0  ;;  %v2054_v41 = vmax.f32 %v2038_v33, 0.0 }
 0x4a4   : > { %2069 = vst [vmem:[%s4182_s9 + $0x70] sm:$0xff] %v2053_v61 }
 0x4a5   : > { %2070 = vst [vmem:[%s4182_s9 + $0x78] sm:$0xff] %v2054_v41 }
 0x4a6   : > { %2409 = shalt.err (!%p2406_p3)
}
 0x4a7   : > { %s2463_s17 = smov 256  }
 0x4a8   : > { %2239 = dma.vmem_to_hbm [thread:$0]  (%p2542_p5), %s2085_s16, 2048, %s2087_s28, %s2072_s22, %s2463_s17, %s2463_s17, %s2449_s21  }
 0x4a9 PF: > { %p2245_p4 = scmp.ge.s32.totalorder %s2444_s27, 2  ;;  %s2101_s9 = sand.u32 1, %s2432_s24  }
 0x4aa   : > { %s2102_s20 = scalar_lea.sflag [#allocation3], %s2101_s9 }
 0x4ab   : > { %p2242_p7 = pnand %p2245_p4, %p2546_p6 }
 0x4ad   : > { %p2243_p8 = pneg %p2242_p7 }
 0x4af   : > { %2427 = dma.done.wait (%p2243_p8), %s2102_s20, 2048  }
 0x4b0   : > { %2429 = vsyncadd (%p2243_p8), %s2102_s20, 4294965248  ;;  %p17_p9 = scmp.ge.s32.totalorder %s2529_s30, 4   ;;  %s4435_s24 = smov %s2436_s25 }
 0x4b1   : > { %s4436_s25 = smov %s2440_s26  ;;  %s4437_s26 = smov %s2540_s10 }
 0x4b2   : > { %s4438_s27 = smov %s2529_s30  ;;  %19 = sbr.rel (!%p17_p9) target bundleno = 3 (0x3), region = 83 }
 0x4b7   :  { %2108 = vsyncpa [#allocation3], 1 }
 0x4b8   :  { %2110 = vsyncpa [#allocation3 + $0x1], 1 }

</bundles_post_ra>
